<compile_context>
chip_gen: v7x
topology: tpu7x:2x2x1
jax: 0.10.0
libtpu: 0.0.40
codegen_flags: <defaults>
</compile_context>

<pallas_src>
import functools

import numpy as np
import jax
import jax.numpy as jnp
from jax.experimental import pallas as pl
from jax.experimental.pallas import tpu as pltpu


# ---------------------------------------------------------------------------
# ROIAlign (aligned=True, sampling_ratio=0) bilinear weights, built in JAX.
# The adaptive sampling grid is separable in y/x, so the dense (P, H*W) weight
# matrix is an outer product of per-axis (pooled, size) weight matrices.
# ---------------------------------------------------------------------------
def _axis_bin_weights(start, length, size, pooled, max_samples):
    """Per-axis aligned-ROIAlign sampling weights, shape (pooled, size);
    1/count is folded in per axis."""
    bin_sz = length / pooled
    grid = jnp.ceil(length / pooled)               # adaptive samples per bin (may be 0)
    grid_safe = jnp.maximum(grid, 1.0)
    p = jnp.arange(pooled, dtype=jnp.float32)[:, None]          # (pooled, 1)
    i = jnp.arange(max_samples, dtype=jnp.float32)[None, :]     # (1, S)
    c = start + p * bin_sz + (i + 0.5) * bin_sz / grid_safe     # (pooled, S)
    valid = (i < grid) & (c >= -1.0) & (c <= size)
    cc = jnp.maximum(c, 0.0)
    low = jnp.floor(cc)
    at_edge = low >= size - 1
    low = jnp.where(at_edge, float(size - 1), low)
    high = jnp.where(at_edge, low, low + 1.0)
    cc = jnp.where(at_edge, low, cc)
    hi_w = cc - low
    lo_w = 1.0 - hi_w
    v = valid.astype(jnp.float32) / grid_safe
    oh_lo = jax.nn.one_hot(low.astype(jnp.int32), size, dtype=jnp.float32)
    oh_hi = jax.nn.one_hot(high.astype(jnp.int32), size, dtype=jnp.float32)
    w = (lo_w * v)[..., None] * oh_lo + (hi_w * v)[..., None] * oh_hi
    return jnp.sum(w, axis=1)                                    # (pooled, size)


def _roi_align_weights(boxes, spatial_scale, H, W, PH, PW):
    """Dense aligned-ROIAlign weights W[r, ph*PW+pw, h*W+w] (jittable, vmapped over ROIs)."""
    sy_max = int(np.ceil(H / PH)) + 1        # static bound on adaptive samples / bin
    sx_max = int(np.ceil(W / PW)) + 1        # (boxes much larger than the image would truncate)

    def one(box):
        x1, y1, x2, y2 = box[0], box[1], box[2], box[3]
        sx = x1 * spatial_scale - 0.5
        ex = x2 * spatial_scale - 0.5
        sy = y1 * spatial_scale - 0.5
        ey = y2 * spatial_scale - 0.5
        wy = _axis_bin_weights(sy, ey - sy, H, PH, sy_max)       # (PH, H)
        wx = _axis_bin_weights(sx, ex - sx, W, PW, sx_max)       # (PW, W)
        full = wy[:, None, :, None] * wx[None, :, None, :]       # (PH, PW, H, W)
        return full.reshape(PH * PW, H * W)

    return jax.vmap(one)(boxes)                                  # (R, P, H*W)


# ---------------------------------------------------------------------------
# The fused head kernel: temporal-mean + ROIAlign + MaxPool2d + Linear + Softmax
# ---------------------------------------------------------------------------
def _fused_roi_head_kernel(bidx_ref, w_ref, feat_ref, wp_ref, bp_ref,
                           o_ref, acc_ref, *,
                           n_roi, p_real, p_pad, t_frames, hw):
    n = pl.program_id(0)

    # Per-ROI pooled-feature accumulator (persists across the batch steps).
    @pl.when(n == 0)
    def _init():
        acc_ref[...] = jnp.full(acc_ref.shape, -jnp.inf, acc_ref.dtype)

    # ROIAlign as one batched MXU matmul for ALL ROIs, with the temporal mean
    # folded into the (1/T-scaled) interpolation weights:
    #   s[c, r*p_pad + p] = sum_t sum_hw x[n, c, t, hw] * Wint[hw, r*p_pad + p]
    w = w_ref[...]                                              # (HW, R*Ppad) bf16, resident
    s = None
    for t in range(t_frames):                                   # static unroll over frames
        ft = feat_ref[0, :, t * hw:(t + 1) * hw].astype(jnp.bfloat16)        # (C, HW)
        d = jnp.dot(ft, w, preferred_element_type=jnp.float32)               # (C, R*Ppad) f32
        s = d if s is None else s + d

    # MaxPool2d(resolution) == max over the p_real bins of each ROI
    # (the 128-aligned slice excludes the zero pad lanes).
    cols = []
    for r in range(n_roi):                                      # static unroll over ROIs
        blk = s[:, r * p_pad: r * p_pad + p_real]               # (C, P)
        cols.append(jnp.max(blk, axis=1, keepdims=True))        # (C, 1)
    pooled = jnp.concatenate(cols, axis=1)                      # (C, R)

    # Keep only the ROIs whose box belongs to this batch element; max-accumulate.
    mine = bidx_ref[...] == n                                   # (1, R)
    acc_ref[...] = jnp.maximum(acc_ref[...], jnp.where(mine, pooled, -jnp.inf))

    # Last batch element: fused Linear + Softmax epilogue (f32; padded classes
    # carry a -1e30 bias so they vanish under the softmax).
    @pl.when(n == pl.num_programs(0) - 1)
    def _finalize():
        logits = jnp.dot(wp_ref[...], acc_ref[...],
                         preferred_element_type=jnp.float32) + bp_ref[...]   # (Kpad, R)
        m = jnp.max(logits, axis=0, keepdims=True)
        e = jnp.exp(logits - m)
        denom = jnp.sum(e, axis=0, keepdims=True)
        o_ref[...] = e * pl.reciprocal(denom, approx=True)      # EUP reciprocal (free slot)


def transformer_roi_head_forward(inputs, bboxes, proj_weight, proj_bias,
                                 pool_size, resolution, scale_factor):
    """inputs: (N, C, T, H, W);  bboxes: (R, 5) = [batch_idx, x1, y1, x2, y2];
       proj_weight: (num_classes, C) [PyTorch nn.Linear layout];  proj_bias: (num_classes,)."""
    N, C, T, H, W = inputs.shape
    assert tuple(pool_size) == (T, 1, 1), \
        "head assumes AvgPool3d over the full temporal extent (output T == 1)"
    PH, PW = resolution
    P = PH * PW
    Ppad = ((P + 127) // 128) * 128          # one (or more) full lane tiles per ROI
    HW = H * W
    R = bboxes.shape[0]
    K = proj_weight.shape[0]
    Kpad = ((K + 127) // 128) * 128          # lane-dense class axis

    # ROIAlign bilinear weights (jittable), temporal mean folded in as a 1/T scale,
    # padded to a full lane tile per ROI and cast to bf16 for the MXU.
    w_all = _roi_align_weights(bboxes[:, 1:5], 1.0 / scale_factor, H, W, PH, PW)   # (R, P, HW)
    w_pad = jnp.pad(w_all, ((0, 0), (0, Ppad - P), (0, 0)))                        # (R, Ppad, HW)
    w2d_t = (w_pad / T).reshape(R * Ppad, HW).T.astype(jnp.bfloat16)               # (HW, R*Ppad)

    # The clip stays in its native NCTHW order — only a free reshape, no HBM transpose pass.
    feat = inputs.reshape(N, C, T * HW)
    bidx = bboxes[:, 0].astype(jnp.int32).reshape(1, R)

    # Projection packed for a (Kpad, C) @ (C, R) epilogue matmul.
    wp = jnp.pad(proj_weight.astype(jnp.float32), ((0, Kpad - K), (0, 0)))         # (Kpad, C)
    bp = jnp.pad(proj_bias.astype(jnp.float32), (0, Kpad - K),
                 constant_values=-1e30).reshape(Kpad, 1)                           # (Kpad, 1)

    kernel = functools.partial(_fused_roi_head_kernel, n_roi=R, p_real=P,
                               p_pad=Ppad, t_frames=T, hw=HW)

    # Grid = (N,): one step per batch element.  Every resident operand (interp weights,
    # projection, batch ids, output) uses a constant index_map so it is DMA'd exactly once,
    # and the clip is read exactly once (one (C, T*HW) slab per step).
    # TODO(synk): for production-size feature maps, add HW/C reduction grid axes (and a
    # parallel axis for v7x megacore) instead of a single slab per batch element.
    out_t = pl.pallas_call(
        kernel,
        out_shape=jax.ShapeDtypeStruct((Kpad, R), jnp.float32),
        grid_spec=pltpu.PrefetchScalarGridSpec(
            num_scalar_prefetch=0,
            grid=(N,),
            in_specs=[
                pl.BlockSpec((1, R), lambda n: (0, 0)),              # box batch ids (resident)
                pl.BlockSpec((HW, R * Ppad), lambda n: (0, 0)),      # interp weights (resident)
                pl.BlockSpec((1, C, T * HW), lambda n: (n, 0, 0)),   # clip slab of batch n
                pl.BlockSpec((Kpad, C), lambda n: (0, 0)),           # projection W (resident)
                pl.BlockSpec((Kpad, 1), lambda n: (0, 0)),           # projection b (resident)
            ],
            out_specs=pl.BlockSpec((Kpad, R), lambda n: (0, 0)),
            scratch_shapes=[pltpu.VMEM((C, R), jnp.float32)],        # pooled-per-ROI accumulator
        ),
        compiler_params=pltpu.CompilerParams(
            dimension_semantics=("arbitrary",),    # accumulator carried across batch steps
            vmem_limit_bytes=32 * 1024 * 1024,
        ),
    )(bidx, w2d_t, feat, wp, bp)

    return out_t[:K, :].T                                            # (R, num_classes)


# ---------------------------------------------------------------------------
# Validation-only numpy reference (detectron2-style aligned ROIAlign) — used
# in __main__ only, never on the forward path.
# ---------------------------------------------------------------------------
def _roi_align_weights_np(boxes, spatial_scale, H, W, ph_out, pw_out):
    R = boxes.shape[0]
    out = np.zeros((R, ph_out * pw_out, H * W), np.float32)
    for r in range(R):
        x1, y1, x2, y2 = [float(v) for v in boxes[r]]
        sw = x1 * spatial_scale - 0.5
        sh = y1 * spatial_scale - 0.5
        rw = x2 * spatial_scale - 0.5 - sw
        rh = y2 * spatial_scale - 0.5 - sh
        bh, bw = rh / ph_out, rw / pw_out
        gh, gw = int(np.ceil(rh / ph_out)), int(np.ceil(rw / pw_out))
        cnt = max(gh * gw, 1)
        for ph in range(ph_out):
            for pw in range(pw_out):
                b = ph * pw_out + pw
                for iy in range(gh):
                    y = sh + ph * bh + (iy + 0.5) * bh / gh
                    if y < -1.0 or y > H:
                        continue
                    yy = max(y, 0.0)
                    yl = int(yy)
                    if yl >= H - 1:
                        yh = yl = H - 1
                        yy = float(yl)
                    else:
                        yh = yl + 1
                    ly = yy - yl
                    hy = 1.0 - ly
                    for ix in range(gw):
                        x = sw + pw * bw + (ix + 0.5) * bw / gw
                        if x < -1.0 or x > W:
                            continue
                        xx = max(x, 0.0)
                        xl = int(xx)
                        if xl >= W - 1:
                            xh = xl = W - 1
                            xx = float(xl)
                        else:
                            xh = xl + 1
                        lx = xx - xl
                        hx = 1.0 - lx
                        out[r, b, yl * W + xl] += hy * hx / cnt
                        out[r, b, yl * W + xh] += hy * lx / cnt
                        out[r, b, yh * W + xl] += ly * hx / cnt
                        out[r, b, yh * W + xh] += ly * lx / cnt
    return out


if __name__ == "__main__":
    # Small shapes consistent with the module's forward.
    N, C, T, H, W = 2, 32, 4, 16, 16            # dim_in = 32
    num_classes = 8
    pool_size = (T, 1, 1)
    resolution = (7, 7)
    scale_factor = 16.0                         # spatial_scale = 1 / 16

    key = jax.random.PRNGKey(0)
    k_in, k_w, k_b = jax.random.split(key, 3)
    inputs = jax.random.normal(k_in, (N, C, T, H, W), dtype=jnp.float32)
    proj_weight = 0.05 * jax.random.normal(k_w, (num_classes, C), dtype=jnp.float32)
    proj_bias = 0.01 * jax.random.normal(k_b, (num_classes,), dtype=jnp.float32)

    # bboxes: (R, 5) = [batch_index, x1, y1, x2, y2] in input-image coordinates
    # (image is H * scale_factor = 256 pixels on a side).
    bboxes = jnp.array([[0.0, 16.0, 24.0, 180.0, 200.0],
                        [1.0, 0.0, 0.0, 255.0, 255.0],
                        [0.0, 40.0, 60.0, 120.0, 100.0]], dtype=jnp.float32)

    # The whole head (weight construction included) is jittable end-to-end now.
    fwd = jax.jit(functools.partial(transformer_roi_head_forward,
                                    pool_size=pool_size, resolution=resolution,
                                    scale_factor=scale_factor))
    out = jax.block_until_ready(fwd(inputs, bboxes, proj_weight, proj_bias))
    out_np = np.asarray(out)

    # ---- numerical check against a straightforward numpy reference ----
    x_np = np.asarray(inputs, np.float32)
    feat_np = x_np.mean(axis=2).reshape(N, C, H * W)             # AvgPool3d + squeeze
    w_np = _roi_align_weights_np(np.asarray(bboxes)[:, 1:5], 1.0 / scale_factor,
                                 H, W, resolution[0], resolution[1])
    pooled_np = np.stack([
        (w_np[r] @ feat_np[int(bboxes[r, 0])].T).max(axis=0)     # ROIAlign + MaxPool2d
        for r in range(bboxes.shape[0])])
    logits_np = pooled_np @ np.asarray(proj_weight).T + np.asarray(proj_bias)
    e = np.exp(logits_np - logits_np.max(axis=1, keepdims=True))
    ref = e / e.sum(axis=1, keepdims=True)

    assert out_np.shape == (bboxes.shape[0], num_classes)
    assert np.allclose(out_np.sum(axis=1), 1.0, atol=5e-3)       # approx EUP reciprocal
    assert np.allclose(out_np, ref, atol=3e-2)                   # bf16 MXU operands, f32 acc
    print("KERNEL_OK")
</pallas_src>

<mosaic_0001>
module attributes {stable_mosaic.version = 11 : i64} {
  func.func @_fused_roi_head_kernel(%arg0: i32, %arg1: memref<1x3xi32, #tpu.memory_space<vmem>>, %arg2: memref<256x384xbf16, #tpu.memory_space<vmem>>, %arg3: memref<1x32x1024xf32, #tpu.memory_space<vmem>>, %arg4: memref<128x32xf32, #tpu.memory_space<vmem>>, %arg5: memref<128x1xf32, #tpu.memory_space<vmem>>, %arg6: memref<128x3xf32, #tpu.memory_space<vmem>>, %arg7: memref<32x3xf32, #tpu.memory_space<vmem>>) attributes {dimension_semantics = [#tpu.dimension_semantics<arbitrary>], iteration_bounds = array<i64: 2>, scalar_prefetch = 0 : i64, scratch_operands = 1 : i64, tpu.core_type = #tpu.core_type<tc>, window_params = [{pipeline_mode = #tpu.pipeline_mode<synchronous>, transform_indices = @transform_0, window_bounds = array<i64: 1, 3>}, {pipeline_mode = #tpu.pipeline_mode<synchronous>, transform_indices = @transform_1, window_bounds = array<i64: 256, 384>}, {transform_indices = @transform_2, window_bounds = array<i64: 1, 32, 1024>}, {pipeline_mode = #tpu.pipeline_mode<synchronous>, transform_indices = @transform_3, window_bounds = array<i64: 128, 32>}, {pipeline_mode = #tpu.pipeline_mode<synchronous>, transform_indices = @transform_4, window_bounds = array<i64: 128, 1>}, {pipeline_mode = #tpu.pipeline_mode<synchronous>, transform_indices = @transform_5, window_bounds = array<i64: 128, 3>}]} {
    %c0_i32 = arith.constant 0 : i32
    %0 = arith.cmpi eq, %arg0, %c0_i32 : i32
    %1 = arith.extui %0 : i1 to i32
    %c0_i32_0 = arith.constant 0 : i32
    %2 = arith.cmpi ne, %1, %c0_i32_0 : i32
    scf.if %2 {
      %cst_25 = arith.constant 0xFF800000 : f32
      %46 = vector.broadcast %cst_25 : f32 to vector<32x3xf32>
      %c0_26 = arith.constant 0 : index
      %c0_27 = arith.constant 0 : index
      %47 = vector.load %arg7[%c0_26, %c0_27] : memref<32x3xf32, #tpu.memory_space<vmem>>, vector<32x3xf32>
      tpu.vector_store %arg7[%c0_26, %c0_27], %46 {strides = array<i32>} : memref<32x3xf32, #tpu.memory_space<vmem>>, vector<32x3xf32>,
    } else {
    }
    %c0 = arith.constant 0 : index
    %c0_1 = arith.constant 0 : index
    %3 = vector.load %arg2[%c0, %c0_1] : memref<256x384xbf16, #tpu.memory_space<vmem>>, vector<256x384xbf16>
    %c0_2 = arith.constant 0 : index
    %c0_3 = arith.constant 0 : index
    %c0_4 = arith.constant 0 : index
    %4 = vector.load %arg3[%c0_2, %c0_3, %c0_4] : memref<1x32x1024xf32, #tpu.memory_space<vmem>>, vector<1x32x256xf32>
    %5 = vector.shape_cast %4 : vector<1x32x256xf32> to vector<32x256xf32>
    %6 = arith.truncf %5 : vector<32x256xf32> to vector<32x256xbf16>
    %cst = arith.constant dense<0.000000e+00> : vector<32x384xf32>
    %7 = tpu.matmul %6, %3, %cst {dimension_numbers = #tpu.dot_dimension_numbers<[1], [0], [0], [1], [0, 0, 1, 1], [], []>} : vector<32x256xbf16>, vector<256x384xbf16>, vector<32x384xf32> -> vector<32x384xf32>
    %c0_5 = arith.constant 0 : index
    %c0_6 = arith.constant 0 : index
    %c256 = arith.constant 256 : index
    %8 = vector.load %arg3[%c0_5, %c0_6, %c256] : memref<1x32x1024xf32, #tpu.memory_space<vmem>>, vector<1x32x256xf32>
    %9 = vector.shape_cast %8 : vector<1x32x256xf32> to vector<32x256xf32>
    %10 = arith.truncf %9 : vector<32x256xf32> to vector<32x256xbf16>
    %cst_7 = arith.constant dense<0.000000e+00> : vector<32x384xf32>
    %11 = tpu.matmul %10, %3, %cst_7 {dimension_numbers = #tpu.dot_dimension_numbers<[1], [0], [0], [1], [0, 0, 1, 1], [], []>} : vector<32x256xbf16>, vector<256x384xbf16>, vector<32x384xf32> -> vector<32x384xf32>
    %12 = arith.addf %7, %11 : vector<32x384xf32>
    %c0_8 = arith.constant 0 : index
    %c0_9 = arith.constant 0 : index
    %c512 = arith.constant 512 : index
    %13 = vector.load %arg3[%c0_8, %c0_9, %c512] : memref<1x32x1024xf32, #tpu.memory_space<vmem>>, vector<1x32x256xf32>
    %14 = vector.shape_cast %13 : vector<1x32x256xf32> to vector<32x256xf32>
    %15 = arith.truncf %14 : vector<32x256xf32> to vector<32x256xbf16>
    %cst_10 = arith.constant dense<0.000000e+00> : vector<32x384xf32>
    %16 = tpu.matmul %15, %3, %cst_10 {dimension_numbers = #tpu.dot_dimension_numbers<[1], [0], [0], [1], [0, 0, 1, 1], [], []>} : vector<32x256xbf16>, vector<256x384xbf16>, vector<32x384xf32> -> vector<32x384xf32>
    %17 = arith.addf %12, %16 : vector<32x384xf32>
    %c0_11 = arith.constant 0 : index
    %c0_12 = arith.constant 0 : index
    %c768 = arith.constant 768 : index
    %18 = vector.load %arg3[%c0_11, %c0_12, %c768] : memref<1x32x1024xf32, #tpu.memory_space<vmem>>, vector<1x32x256xf32>
    %19 = vector.shape_cast %18 : vector<1x32x256xf32> to vector<32x256xf32>
    %20 = arith.truncf %19 : vector<32x256xf32> to vector<32x256xbf16>
    %cst_13 = arith.constant dense<0.000000e+00> : vector<32x384xf32>
    %21 = tpu.matmul %20, %3, %cst_13 {dimension_numbers = #tpu.dot_dimension_numbers<[1], [0], [0], [1], [0, 0, 1, 1], [], []>} : vector<32x256xbf16>, vector<256x384xbf16>, vector<32x384xf32> -> vector<32x384xf32>
    %22 = arith.addf %17, %21 : vector<32x384xf32>
    %23 = vector.extract_strided_slice %22 {offsets = [0, 0], sizes = [32, 49], strides = [1, 1]} : vector<32x384xf32> to vector<32x49xf32>
    %cst_14 = arith.constant dense<0xFF800000> : vector<32xf32>
    %24 = vector.multi_reduction <maximumf>, %23, %cst_14 [1] : vector<32x49xf32> to vector<32xf32>
    %25 = vector.shape_cast %24 : vector<32xf32> to vector<32x1xf32>
    %26 = vector.extract_strided_slice %22 {offsets = [0, 128], sizes = [32, 49], strides = [1, 1]} : vector<32x384xf32> to vector<32x49xf32>
    %cst_15 = arith.constant dense<0xFF800000> : vector<32xf32>
    %27 = vector.multi_reduction <maximumf>, %26, %cst_15 [1] : vector<32x49xf32> to vector<32xf32>
    %28 = vector.shape_cast %27 : vector<32xf32> to vector<32x1xf32>
    %29 = vector.extract_strided_slice %22 {offsets = [0, 256], sizes = [32, 49], strides = [1, 1]} : vector<32x384xf32> to vector<32x49xf32>
    %cst_16 = arith.constant dense<0xFF800000> : vector<32xf32>
    %30 = vector.multi_reduction <maximumf>, %29, %cst_16 [1] : vector<32x49xf32> to vector<32xf32>
    %31 = vector.shape_cast %30 : vector<32xf32> to vector<32x1xf32>
    %32 = tpu.concatenate %25, %28, %31 in 1 : vector<32x1xf32>, vector<32x1xf32>, vector<32x1xf32> -> vector<32x3xf32>
    %c0_17 = arith.constant 0 : index
    %c0_18 = arith.constant 0 : index
    %33 = vector.load %arg1[%c0_17, %c0_18] : memref<1x3xi32, #tpu.memory_space<vmem>>, vector<1x3xi32>
    %34 = vector.broadcast %arg0 : i32 to vector<1x3xi32>
    %35 = arith.cmpi eq, %33, %34 : vector<1x3xi32>
    %c0_19 = arith.constant 0 : index
    %c0_20 = arith.constant 0 : index
    %36 = vector.load %arg7[%c0_19, %c0_20] : memref<32x3xf32, #tpu.memory_space<vmem>>, vector<32x3xf32>
    %cst_21 = arith.constant 0xFF800000 : f32
    %37 = vector.shape_cast %35 : vector<1x3xi1> to vector<1x3xi1>
    %38 = vector.broadcast %37 : vector<1x3xi1> to vector<32x3xi1>
    %39 = vector.broadcast %cst_21 : f32 to vector<32x3xf32>
    %40 = arith.select %38, %32, %39 : vector<32x3xi1>, vector<32x3xf32>
    %41 = arith.maximumf %36, %40 : vector<32x3xf32>
    %c0_22 = arith.constant 0 : index
    %c0_23 = arith.constant 0 : index
    %42 = vector.load %arg7[%c0_22, %c0_23] : memref<32x3xf32, #tpu.memory_space<vmem>>, vector<32x3xf32>
    tpu.vector_store %arg7[%c0_22, %c0_23], %41 {strides = array<i32>} : memref<32x3xf32, #tpu.memory_space<vmem>>, vector<32x3xf32>,
    %c1_i32 = arith.constant 1 : i32
    %43 = arith.cmpi eq, %arg0, %c1_i32 : i32
    %44 = arith.extui %43 : i1 to i32
    %c0_i32_24 = arith.constant 0 : i32
    %45 = arith.cmpi ne, %44, %c0_i32_24 : i32
    scf.if %45 {
      %c0_25 = arith.constant 0 : index
      %c0_26 = arith.constant 0 : index
      %46 = vector.load %arg4[%c0_25, %c0_26] : memref<128x32xf32, #tpu.memory_space<vmem>>, vector<128x32xf32>
      %c0_27 = arith.constant 0 : index
      %c0_28 = arith.constant 0 : index
      %47 = vector.load %arg7[%c0_27, %c0_28] : memref<32x3xf32, #tpu.memory_space<vmem>>, vector<32x3xf32>
      %cst_29 = arith.constant dense<0.000000e+00> : vector<128x3xf32>
      %48 = tpu.matmul %46, %47, %cst_29 {dimension_numbers = #tpu.dot_dimension_numbers<[1], [0], [0], [1], [0, 0, 1, 1], [], []>} : vector<128x32xf32>, vector<32x3xf32>, vector<128x3xf32> -> vector<128x3xf32>
      %c0_30 = arith.constant 0 : index
      %c0_31 = arith.constant 0 : index
      %49 = vector.load %arg5[%c0_30, %c0_31] : memref<128x1xf32, #tpu.memory_space<vmem>>, vector<128x1xf32>
      %50 = vector.broadcast %49 : vector<128x1xf32> to vector<128x3xf32>
      %51 = arith.addf %48, %50 : vector<128x3xf32>
      %cst_32 = arith.constant dense<0xFF800000> : vector<3xf32>
      %52 = vector.multi_reduction <maximumf>, %51, %cst_32 [0] : vector<128x3xf32> to vector<3xf32>
      %53 = vector.shape_cast %52 : vector<3xf32> to vector<1x3xf32>
      %54 = vector.broadcast %53 : vector<1x3xf32> to vector<128x3xf32>
      %55 = arith.subf %51, %54 : vector<128x3xf32>
      %56 = math.exp %55 : vector<128x3xf32>
      %cst_33 = arith.constant dense<0.000000e+00> : vector<3xf32>
      %57 = vector.multi_reduction <add>, %56, %cst_33 [0] : vector<128x3xf32> to vector<3xf32>
      %58 = vector.shape_cast %57 : vector<3xf32> to vector<1x3xf32>
      %59 = tpu.reciprocal %58 {approx = true} : vector<1x3xf32> -> vector<1x3xf32>
      %60 = vector.broadcast %59 : vector<1x3xf32> to vector<128x3xf32>
      %61 = arith.mulf %56, %60 : vector<128x3xf32>
      %c0_34 = arith.constant 0 : index
      %c0_35 = arith.constant 0 : index
      %62 = vector.load %arg6[%c0_34, %c0_35] : memref<128x3xf32, #tpu.memory_space<vmem>>, vector<128x3xf32>
      tpu.vector_store %arg6[%c0_34, %c0_35], %61 {strides = array<i32>} : memref<128x3xf32, #tpu.memory_space<vmem>>, vector<128x3xf32>,
    } else {
    }
    return
  }
  func.func @transform_0(%arg0: i32) -> (i32, i32) {
    %c0_i32 = arith.constant 0 : i32
    %c0_i32_0 = arith.constant 0 : i32
    %c0_i32_1 = arith.constant 0 : i32
    return %c0_i32, %c0_i32_0 : i32, i32
  }
  func.func @transform_1(%arg0: i32) -> (i32, i32) {
    %c0_i32 = arith.constant 0 : i32
    %c0_i32_0 = arith.constant 0 : i32
    %c0_i32_1 = arith.constant 0 : i32
    return %c0_i32, %c0_i32_0 : i32, i32
  }
  func.func @transform_2(%arg0: i32) -> (i32, i32, i32) {
    %c0_i32 = arith.constant 0 : i32
    %c0_i32_0 = arith.constant 0 : i32
    %c0_i32_1 = arith.constant 0 : i32
    return %arg0, %c0_i32, %c0_i32_0 : i32, i32, i32
  }
  func.func @transform_3(%arg0: i32) -> (i32, i32) {
    %c0_i32 = arith.constant 0 : i32
    %c0_i32_0 = arith.constant 0 : i32
    %c0_i32_1 = arith.constant 0 : i32
    return %c0_i32, %c0_i32_0 : i32, i32
  }
  func.func @transform_4(%arg0: i32) -> (i32, i32) {
    %c0_i32 = arith.constant 0 : i32
    %c0_i32_0 = arith.constant 0 : i32
    %c0_i32_1 = arith.constant 0 : i32
    return %c0_i32, %c0_i32_0 : i32, i32
  }
  func.func @transform_5(%arg0: i32) -> (i32, i32) {
    %c0_i32 = arith.constant 0 : i32
    %c0_i32_0 = arith.constant 0 : i32
    %c0_i32_1 = arith.constant 0 : i32
    return %c0_i32, %c0_i32_0 : i32, i32
  }
}

</mosaic_0001>

<bundles_post_ra>
// kernel: transformer_roi_head_forward.1
= control target key start
LH: loop header
LB: loop body
LE: loop exit
PB: predicated region body
PF: predicated region fallthrough
CT: control target
= control target key end

     0   :  { %s2017_s18 = smov 0   ;;  %s2888_s0 = inlined_call_operand.vmem [shape: s32[1,3], index: 0, kind: input, shape index: {}]   ;;  %s2889_s1 = inlined_call_operand.vmem [shape: bf16[256,384], index: 1, kind: input, shape index: {}]   ;;  %s2890_s2 = inlined_call_operand.vmem [shape: f32[2,32,1024], index: 2, kind: input, shape index: {}]   ;;  %s2891_s3 = inlined_call_operand.vmem [shape: f32[128,32], index: 3, kind: input, shape index: {}]   ;;  %s2892_s4 = inlined_call_operand.vmem [shape: f32[128,1], index: 4, kind: input, shape index: {}]   ;;  %s2893_s5 = inlined_call_operand.vmem [shape: f32[128,3], index: 5, kind: output, shape index: {}]  }
   0x1 LB: > { %s2023_s19 = sadd.s32 4294967295, %s1982_s18   ;;  %p1593_p0 = scmp.ge.s32.totalorder %s1982_s18, 1  ;;  %s1982_s18 = sphi %s2017_s18, %s15_s18  }
   0x2   : > { %p182_p1 = scmp.lt.s32.totalorder %s1982_s18, 3 }
   0x4   : > { %p183_p2 = pnand %p1593_p0, %p182_p1 }
   0x5   : > { %p205_p3 = scmp.lt.s32.totalorder (!%p183_p2), %s2023_s19, 1  ;;  %p1596_p4 = scmp.ne.s32.totalorder (!%p183_p2), %s2023_s19, 0 }
   0x6   : > { %186 = sbr.rel (%p183_p2) target bundleno = 945 (0x3b1), region = 40 }
   0xd   : > { %s206_s20 = scalar_select %p205_p3, %s2023_s19, 1 }
   0xe   : > { %214 = sbr.rel (%p1596_p4) target bundleno = 21 (0x15), region = 44  ;;  %vm215_vm0 = vcmask (!%p1596_p4), 23552   ;;  %v1984_v0 = vmov (!%p1596_p4), -inf  }
   0xf   : > { %s1664_s21 = sshll.u32 %s206_s20, 8  ;;  %216 = vst.msk [vmem:[#allocation2] sm:$0xff] (!%p1596_p4), %vm215_vm0, %v1984_v0  ;;  %217 = vst.msk [vmem:[#allocation2 + $0x8] sm:$0xff] (!%p1596_p4), %vm215_vm0, %v1984_v0 }
  0x10   : > { %s2032_s24 = scalar_lea.vmem %s2890_s2, %s1664_s21  ;;  %218 = vst.msk [vmem:[#allocation2 + $0x10] sm:$0xff] (!%p1596_p4), %vm215_vm0, %v1984_v0  ;;  %219 = vst.msk [vmem:[#allocation2 + $0x18] sm:$0xff] (!%p1596_p4), %vm215_vm0, %v1984_v0 }
  0x15 PF: > { %v2038_v1 = vld [vmem:[%s2889_s1 + $0x4] ss:$12 sps:$4 sm:$0xff]   ;;  %v2043_v2 = vld [vmem:[%s2889_s1] ss:$12 sps:$4 sm:$0xff]   ;;  %v2050_v3 = vld [vmem:[%s2889_s1 + $0x1c] ss:$12 sps:$4 sm:$0xff]  }
  0x16   : > { %564 = vmatprep.subr.bf16.mxu1 %v2038_v1  ;;  %666 = vmatprep.subr.bf16.mxu0 %v2038_v1  ;;  %v2057_v4 = vld [vmem:[%s2889_s1 + $0x18] ss:$12 sps:$4 sm:$0xff]   ;;  %v2064_v5 = vld [vmem:[%s2889_s1 + $0x34] ss:$12 sps:$4 sm:$0xff]   ;;  %v2071_v6 = vld [vmem:[%s2889_s1 + $0x30] ss:$12 sps:$4 sm:$0xff]  }
  0x17   : > { %565 = vmatpush1.bf16.msra.mxu1 %v2043_v2  ;;  %667 = vmatpush1.bf16.msra.mxu0 %v2043_v2  ;;  %v2078_v7 = vld [vmem:[%s2889_s1 + $0x4c] ss:$12 sps:$4 sm:$0xff]   ;;  %v2085_v8 = vld [vmem:[%s2889_s1 + $0x48] ss:$12 sps:$4 sm:$0xff]   ;;  %v2092_v9 = vld [vmem:[%s2889_s1 + $0x64] ss:$12 sps:$4 sm:$0xff]  }
  0x18   : > { %566 = vmatprep.subr.bf16.mxu1 %v2050_v3  ;;  %668 = vmatprep.subr.bf16.mxu0 %v2050_v3  ;;  %v2099_v10 = vld [vmem:[%s2889_s1 + $0x60] ss:$12 sps:$4 sm:$0xff]   ;;  %v2106_v11 = vld [vmem:[%s2889_s1 + $0x7c] ss:$12 sps:$4 sm:$0xff]   ;;  %v2113_v12 = vld [vmem:[%s2889_s1 + $0x78] ss:$12 sps:$4 sm:$0xff]  }
  0x19   : > { %v2120_v13 = vld [vmem:[%s2889_s1 + $0x94] ss:$12 sps:$4 sm:$0xff]   ;;  %v297_v14 = vld [vmem:[%s2032_s24 + $0x18] sm:$0xff]  ;;  %v285_v19 = vld [vmem:[%s2032_s24 + $0x8] sm:$0xff]  ;;  %vm1020_vm1 = vcmask 400384   ;;  %vm1062_vm3 = vcmask 15360  }
  0x1a   : > { %v299_v15 = vld [vmem:[%s2032_s24 + $0x58] sm:$0xff]  ;;  %v287_v20 = vld [vmem:[%s2032_s24 + $0x48] sm:$0xff]  ;;  %v2157_v23 = vld [vmem:[%s2889_s1 + $0xc4] ss:$12 sps:$4 sm:$0xff]   ;;  %vm1057_vm4 = vcmask 7168   ;;  %vm1088_vm6 = vcmask 23552  }
  0x1b   : > { %567 = vmatpush1.bf16.msra.mxu1 %v2057_v4  ;;  %669 = vmatpush1.bf16.msra.mxu0 %v2057_v4  ;;  %v2127_v16 = vld [vmem:[%s2889_s1 + $0x90] ss:$12 sps:$4 sm:$0xff]   ;;  %v2129_v17 = vpack.c.bf16 %v299_v15, %v297_v14  ;;  %v2136_v18 = vld [vmem:[%s2889_s1 + $0xac] ss:$12 sps:$4 sm:$0xff]   ;;  %v2143_v21 = vpack.c.bf16 %v287_v20, %v285_v19  ;;  %v2150_v22 = vld [vmem:[%s2889_s1 + $0xa8] ss:$12 sps:$4 sm:$0xff]  }
  0x1c   : > { %568 = vmatprep.subr.bf16.mxu1 %v2064_v5  ;;  %670 = vmatprep.subr.bf16.mxu0 %v2064_v5  ;;  %v2165_v24 = vld [vmem:[%s2889_s1 + $0xc0] ss:$12 sps:$4 sm:$0xff]   ;;  %v2172_v25 = vld [vmem:[%s2889_s1 + $0xdc] ss:$12 sps:$4 sm:$0xff]   ;;  %v2179_v26 = vld [vmem:[%s2889_s1 + $0xd8] ss:$12 sps:$4 sm:$0xff]  }
  0x1d   : > { %596 = vmatprep.mubr.bf16.mxu1 %v2129_v17  ;;  %698 = vmatprep.mubr.bf16.mxu0 %v2143_v21  ;;  %v2186_v27 = vld [vmem:[%s2889_s1 + $0xf4] ss:$12 sps:$4 sm:$0xff]   ;;  %v2193_v28 = vld [vmem:[%s2889_s1 + $0xf0] ss:$12 sps:$4 sm:$0xff]   ;;  %v2200_v29 = vld [vmem:[%s2889_s1 + $0x10c] ss:$12 sps:$4 sm:$0xff]  }
  0x1e   : > { %v2207_v30 = vld [vmem:[%s2889_s1 + $0x108] ss:$12 sps:$4 sm:$0xff]   ;;  %v2214_v31 = vld [vmem:[%s2889_s1 + $0x124] ss:$12 sps:$4 sm:$0xff]   ;;  %v2221_v32 = vld [vmem:[%s2889_s1 + $0x120] ss:$12 sps:$4 sm:$0xff]  }
  0x1f   : > { %569 = vmatpush1.bf16.msra.mxu1 %v2071_v6  ;;  %671 = vmatpush1.bf16.msra.mxu0 %v2071_v6  ;;  %v2228_v33 = vld [vmem:[%s2889_s1 + $0x13c] ss:$12 sps:$4 sm:$0xff]   ;;  %v2235_v34 = vld [vmem:[%s2889_s1 + $0x138] ss:$12 sps:$4 sm:$0xff]   ;;  %v2242_v35 = vld [vmem:[%s2889_s1 + $0x154] ss:$12 sps:$4 sm:$0xff]  }
  0x20   : > { %570 = vmatprep.subr.bf16.mxu1 %v2078_v7  ;;  %672 = vmatprep.subr.bf16.mxu0 %v2078_v7  ;;  %v2249_v36 = vld [vmem:[%s2889_s1 + $0x150] ss:$12 sps:$4 sm:$0xff]   ;;  %v2256_v37 = vld [vmem:[%s2889_s1 + $0x16c] ss:$12 sps:$4 sm:$0xff]   ;;  %v2261_v38 = vld [vmem:[%s2889_s1 + $0x168] ss:$12 sps:$4 sm:$0xff]  }
  0x21   : > { %v296_v39 = vld [vmem:[%s2032_s24 + $0x10] sm:$0xff]  ;;  %v284_v41 = vld [vmem:[%s2032_s24] sm:$0xff]  ;;  %v301_v44 = vld [vmem:[%s2032_s24 + $0x98] sm:$0xff]  ;;  %p1645_p5 = scmp.ne.s32.totalorder %s2023_s19, 1 }
  0x22   : > { %v298_v40 = vld [vmem:[%s2032_s24 + $0x50] sm:$0xff]  ;;  %v286_v42 = vld [vmem:[%s2032_s24 + $0x40] sm:$0xff]  ;;  %v303_v47 = vld [vmem:[%s2032_s24 + $0xd8] sm:$0xff]  ;;  %vm1213_vm7 = vcmask (!%p1645_p5), 261120  }
  0x23   : > { %571 = vmatpush1.bf16.msra.mxu1 %v2085_v8  ;;  %673 = vmatpush1.bf16.msra.mxu0 %v2085_v8  ;;  %v2274_v43 = vld [vmem:[%s2889_s1 + $0xc8] ss:$12 sps:$4 sm:$0xff]   ;;  %v2277_v45 = vpack.c.bf16 %v298_v40, %v296_v39  ;;  %v2279_v46 = vpack.c.bf16 %v286_v42, %v284_v41  ;;  %v2296_v51 = vld [vmem:[%s2889_s1 + $0xe0] ss:$12 sps:$4 sm:$0xff]   ;;  %v2298_v52 = vpack.c.bf16 %v303_v47, %v301_v44  ;;  %v2320_v59 = vld [vmem:[%s2889_s1 + $0xf8] ss:$12 sps:$4 sm:$0xff]  }
  0x24   : > { %572 = vmatprep.subr.bf16.mxu1 %v2092_v9  ;;  %674 = vmatprep.subr.bf16.mxu0 %v2092_v9  ;;  %v289_v48 = vld [vmem:[%s2032_s24 + $0x88] sm:$0xff]  ;;  %v300_v55 = vld [vmem:[%s2032_s24 + $0x90] sm:$0xff]  ;;  %v288_v57 = vld [vmem:[%s2032_s24 + $0x80] sm:$0xff] }
  0x25   : > { %v291_v49 = vld [vmem:[%s2032_s24 + $0xc8] sm:$0xff]  ;;  %v302_v56 = vld [vmem:[%s2032_s24 + $0xd0] sm:$0xff]  ;;  %v290_v58 = vld [vmem:[%s2032_s24 + $0xc0] sm:$0xff] }
  0x26   : > { %v2289_v50 = vld [vmem:[%s2889_s1 + $0x8] ss:$12 sps:$4 sm:$0xff]   ;;  %v2300_v53 = vpack.c.bf16 %v291_v49, %v289_v48  ;;  %v2307_v54 = vld [vmem:[%s2889_s1 + $0x20] ss:$12 sps:$4 sm:$0xff]   ;;  %v306_v60 = vpack.c.bf16 %v302_v56, %v300_v55  ;;  %v2324_v61 = vpack.c.bf16 %v290_v58, %v288_v57  ;;  %v2333_v0 = vld [vmem:[%s2889_s1 + $0x38] ss:$12 sps:$4 sm:$0xff]  }
  0x27   : > { %573 = vmatpush1.bf16.msra.mxu1 %v2099_v10  ;;  %675 = vmatpush1.bf16.msra.mxu0 %v2099_v10  ;;  %v769_v62 = vld [vmem:[%s2032_s24 + $0x28] sm:$0xff]  ;;  %v2340_v14 = vld [vmem:[%s2889_s1 + $0x110] ss:$12 sps:$4 sm:$0xff]   ;;  %v2387_v41 = vld [vmem:[%s2889_s1 + $0x158] ss:$12 sps:$4 sm:$0xff]  }
  0x28   : > { %574 = vmatprep.subr.bf16.mxu1 %v2106_v11  ;;  %676 = vmatprep.subr.bf16.mxu0 %v2106_v11  ;;  %v771_v63 = vld [vmem:[%s2032_s24 + $0x68] sm:$0xff]  ;;  %v2350_v19 = vld [vmem:[%s2889_s1 + $0x50] ss:$12 sps:$4 sm:$0xff]   ;;  %v2394_v42 = vld [vmem:[%s2889_s1 + $0x98] ss:$12 sps:$4 sm:$0xff]  }
  0x29   : > { %v2342_v15 = vpack.c.bf16 %v771_v63, %v769_v62  ;;  %v2357_v20 = vld [vmem:[%s2889_s1 + $0x128] ss:$12 sps:$4 sm:$0xff]   ;;  %v2373_v40 = vld [vmem:[%s2889_s1 + $0x140] ss:$12 sps:$4 sm:$0xff]   ;;  %v2401_v44 = vld [vmem:[%s2889_s1 + $0x170] ss:$12 sps:$4 sm:$0xff]  }
  0x2a   : > { %v2366_v39 = vld [vmem:[%s2889_s1 + $0x68] ss:$12 sps:$4 sm:$0xff]   ;;  %v2408_v47 = vld [vmem:[%s2889_s1 + $0xb0] ss:$12 sps:$4 sm:$0xff]   ;;  %v772_v56 = vld [vmem:[%s2032_s24 + $0xa0] sm:$0xff] }
  0x2b   : > { %575 = vmatpush1.bf16.msra.mxu1 %v2113_v12  ;;  %677 = vmatpush1.bf16.msra.mxu0 %v2113_v12  ;;  %v773_v49 = vld [vmem:[%s2032_s24 + $0xa8] sm:$0xff]  ;;  %v774_v57 = vld [vmem:[%s2032_s24 + $0xe0] sm:$0xff]  ;;  %v897_v58 = vld [vmem:[%s2032_s24 + $0x78] sm:$0xff] }
  0x2c   : > { %576 = vmatprep.subr.bf16.mxu1 %v2120_v13  ;;  %678 = vmatprep.subr.bf16.mxu0 %v2120_v13 }
  0x2f   : > { %577 = vmatpush1.bf16.msra.mxu1 %v2127_v16  ;;  %679 = vmatpush1.bf16.msra.mxu0 %v2127_v16 }
  0x30   : > { %578 = vmatprep.subr.bf16.mxu1 %v2136_v18  ;;  %680 = vmatprep.subr.bf16.mxu0 %v2136_v18 }
  0x33   : > { %579 = vmatpush1.bf16.msra.mxu1 %v2150_v22  ;;  %681 = vmatpush1.bf16.msra.mxu0 %v2150_v22 }
  0x34   : > { %580 = vmatprep.subr.bf16.mxu1 %v2157_v23  ;;  %682 = vmatprep.subr.bf16.mxu0 %v2157_v23 }
  0x37   : > { %581 = vmatpush1.bf16.msra.mxu1 %v2165_v24  ;;  %683 = vmatpush1.bf16.msra.mxu0 %v2165_v24 }
  0x38   : > { %582 = vmatprep.subr.bf16.mxu1 %v2172_v25  ;;  %684 = vmatprep.subr.bf16.mxu0 %v2172_v25 }
  0x3b   : > { %583 = vmatpush1.bf16.msra.mxu1 %v2179_v26  ;;  %685 = vmatpush1.bf16.msra.mxu0 %v2179_v26 }
  0x3c   : > { %584 = vmatprep.subr.bf16.mxu1 %v2186_v27  ;;  %686 = vmatprep.subr.bf16.mxu0 %v2186_v27 }
  0x3f   : > { %585 = vmatpush1.bf16.msra.mxu1 %v2193_v28  ;;  %687 = vmatpush1.bf16.msra.mxu0 %v2193_v28 }
  0x40   : > { %586 = vmatprep.subr.bf16.mxu1 %v2200_v29  ;;  %688 = vmatprep.subr.bf16.mxu0 %v2200_v29 }
  0x43   : > { %587 = vmatpush1.bf16.msra.mxu1 %v2207_v30  ;;  %689 = vmatpush1.bf16.msra.mxu0 %v2207_v30 }
  0x44   : > { %588 = vmatprep.subr.bf16.mxu1 %v2214_v31  ;;  %690 = vmatprep.subr.bf16.mxu0 %v2214_v31 }
  0x47   : > { %589 = vmatpush1.bf16.msra.mxu1 %v2221_v32  ;;  %691 = vmatpush1.bf16.msra.mxu0 %v2221_v32 }
  0x48   : > { %590 = vmatprep.subr.bf16.mxu1 %v2228_v33  ;;  %692 = vmatprep.subr.bf16.mxu0 %v2228_v33 }
  0x4b   : > { %591 = vmatpush1.bf16.msra.mxu1 %v2235_v34  ;;  %693 = vmatpush1.bf16.msra.mxu0 %v2235_v34 }
  0x4c   : > { %592 = vmatprep.subr.bf16.mxu1 %v2242_v35  ;;  %694 = vmatprep.subr.bf16.mxu0 %v2242_v35 }
  0x4f   : > { %593 = vmatpush1.bf16.msra.mxu1 %v2249_v36  ;;  %695 = vmatpush1.bf16.msra.mxu0 %v2249_v36 }
  0x50   : > { %594 = vmatprep.subr.bf16.mxu1 %v2256_v37  ;;  %696 = vmatprep.subr.bf16.mxu0 %v2256_v37 }
  0x53   : > { %595 = vmatpush1.bf16.msra.mxu1 %v2261_v38  ;;  %697 = vmatpush1.bf16.msra.mxu0 %v2261_v38 }
  0x54   : > { %1665 = vmatprep.subr.bf16.mxu1 %v2274_v43  ;;  %780 = vmatprep.subr.bf16.mxu0 %v2038_v1 }
  0x56   : > { %597 = vmatmul.mubr.bf16.vlgmr.msra.gmra.mrb[0].mxu1 %v2277_v45  ;;  %699 = vmatmul.mubr.bf16.vlgmr.msra.gmra.mrb[0].mxu0 %v2279_v46 }
  0x57   : > { %1666 = vmatpush3.bf16.msra.mxu1 %v2289_v50  ;;  %781 = vmatpush1.bf16.msra.mxu0 %v2043_v2 }
  0x58   : > { %1667 = vmatprep.subr.bf16.mxu1 %v2296_v51  ;;  %782 = vmatprep.subr.bf16.mxu0 %v2050_v3 }
  0x59   : > { %606 = vmatprep.mubr.bf16.mxu1 %v2298_v52  ;;  %708 = vmatprep.mubr.bf16.mxu0 %v2300_v53 }
  0x5b   : > { %1668 = vmatpush3.bf16.msra.mxu1 %v2307_v54  ;;  %783 = vmatpush1.bf16.msra.mxu0 %v2057_v4 }
  0x5c   : > { %1669 = vmatprep.subr.bf16.mxu1 %v2320_v59  ;;  %784 = vmatprep.subr.bf16.mxu0 %v2064_v5 }
  0x5e   : > { %607 = vmatmul.mubr.bf16.gmra.mrb[4].mxu1 %v306_v60  ;;  %709 = vmatmul.mubr.bf16.gmra.mrb[4].mxu0 %v2324_v61 }
  0x5f   : > { %1670 = vmatpush3.bf16.msra.mxu1 %v2333_v0  ;;  %785 = vmatpush1.bf16.msra.mxu0 %v2071_v6 }
  0x60   : > { %1671 = vmatprep.subr.bf16.mxu1 %v2340_v14  ;;  %786 = vmatprep.subr.bf16.mxu0 %v2078_v7 }
  0x61   : > { %649 = vmatprep.mubr.bf16.mxu1 %v2129_v17  ;;  %812 = vmatprep.mubr.bf16.mxu0 %v2342_v15  ;;  %v2380_v17 = vld [vmem:[%s2889_s1 + $0x80] ss:$12 sps:$4 sm:$0xff]  }
  0x63   : > { %1672 = vmatpush3.bf16.msra.mxu1 %v2350_v19  ;;  %787 = vmatpush1.bf16.msra.mxu0 %v2085_v8 }
  0x64   : > { %1673 = vmatprep.subr.bf16.mxu1 %v2357_v20  ;;  %788 = vmatprep.subr.bf16.mxu0 %v2092_v9 }
  0x67   : > { %1674 = vmatpush3.bf16.msra.mxu1 %v2366_v39  ;;  %789 = vmatpush1.bf16.msra.mxu0 %v2099_v10 }
  0x68   : > { %1675 = vmatprep.subr.bf16.mxu1 %v2373_v40  ;;  %790 = vmatprep.subr.bf16.mxu0 %v2106_v11 }
  0x6b   : > { %1676 = vmatpush3.bf16.msra.mxu1 %v2380_v17  ;;  %791 = vmatpush1.bf16.msra.mxu0 %v2113_v12 }
  0x6c   : > { %1677 = vmatprep.subr.bf16.mxu1 %v2387_v41  ;;  %792 = vmatprep.subr.bf16.mxu0 %v2120_v13 }
  0x6f   : > { %1678 = vmatpush3.bf16.msra.mxu1 %v2394_v42  ;;  %793 = vmatpush1.bf16.msra.mxu0 %v2127_v16 }
  0x70   : > { %1679 = vmatprep.subr.bf16.mxu1 %v2401_v44  ;;  %794 = vmatprep.subr.bf16.mxu0 %v2136_v18 }
  0x73   : > { %1680 = vmatpush3.bf16.msra.mxu1 %v2408_v47  ;;  %795 = vmatpush1.bf16.msra.mxu0 %v2150_v22 }
  0x74   : > { %1693 = vmatprep.subr.bf16.mxu1 %v2274_v43  ;;  %796 = vmatprep.subr.bf16.mxu0 %v2157_v23 }
  0x76   : > { %650 = vmatmul.mubr.bf16.vlgmr.msra.gmra.mrb[8].mxu1 %v2277_v45  ;;  %v770_v45 = vld [vmem:[%s2032_s24 + $0x60] sm:$0xff] }
  0x77   : > { %1694 = vmatpush3.bf16.msra.mxu1 %v2289_v50  ;;  %797 = vmatpush1.bf16.msra.mxu0 %v2165_v24 }
  0x78   : > { %1695 = vmatprep.subr.bf16.mxu1 %v2296_v51  ;;  %798 = vmatprep.subr.bf16.mxu0 %v2172_v25 }
  0x79   : > { %657 = vmatprep.mubr.bf16.mxu1 %v2298_v52  ;;  %v775_v52 = vld [vmem:[%s2032_s24 + $0xe8] sm:$0xff] }
  0x7a   : > { %v779_v55 = vpack.c.bf16 %v775_v52, %v773_v49 }
  0x7b   : > { %1696 = vmatpush3.bf16.msra.mxu1 %v2307_v54  ;;  %799 = vmatpush1.bf16.msra.mxu0 %v2179_v26 }
  0x7c   : > { %1697 = vmatprep.subr.bf16.mxu1 %v2320_v59  ;;  %800 = vmatprep.subr.bf16.mxu0 %v2186_v27 }
  0x7e   : > { %658 = vmatmul.mubr.bf16.gmra.mrb[12].mxu1 %v306_v60 }
  0x7f   : > { %1698 = vmatpush3.bf16.msra.mxu1 %v2333_v0  ;;  %801 = vmatpush1.bf16.msra.mxu0 %v2193_v28 }
  0x80   : > { %1699 = vmatprep.subr.bf16.mxu1 %v2340_v14  ;;  %802 = vmatprep.subr.bf16.mxu0 %v2200_v29 }
  0x81   : > { %751 = vmatprep.mubr.bf16.mxu1 %v2143_v21  ;;  %v768_v21 = vld [vmem:[%s2032_s24 + $0x20] sm:$0xff] }
  0x82   : > { %v776_v48 = vpack.c.bf16 %v770_v45, %v768_v21 }
  0x83   : > { %1700 = vmatpush3.bf16.msra.mxu1 %v2350_v19  ;;  %803 = vmatpush1.bf16.msra.mxu0 %v2207_v30 }
  0x84   : > { %1701 = vmatprep.subr.bf16.mxu1 %v2357_v20  ;;  %804 = vmatprep.subr.bf16.mxu0 %v2214_v31 }
  0x87   : > { %1702 = vmatpush3.bf16.msra.mxu1 %v2366_v39  ;;  %805 = vmatpush1.bf16.msra.mxu0 %v2221_v32 }
  0x88   : > { %1703 = vmatprep.subr.bf16.mxu1 %v2373_v40  ;;  %806 = vmatprep.subr.bf16.mxu0 %v2228_v33 }
  0x8b   : > { %1704 = vmatpush3.bf16.msra.mxu1 %v2380_v17  ;;  %807 = vmatpush1.bf16.msra.mxu0 %v2235_v34 }
  0x8c   : > { %1705 = vmatprep.subr.bf16.mxu1 %v2387_v41  ;;  %808 = vmatprep.subr.bf16.mxu0 %v2242_v35 }
  0x8f   : > { %1706 = vmatpush3.bf16.msra.mxu1 %v2394_v42  ;;  %809 = vmatpush1.bf16.msra.mxu0 %v2249_v36 }
  0x90   : > { %1707 = vmatprep.subr.bf16.mxu1 %v2401_v44  ;;  %810 = vmatprep.subr.bf16.mxu0 %v2256_v37 }
  0x93   : > { %1708 = vmatpush3.bf16.msra.mxu1 %v2408_v47  ;;  %811 = vmatpush1.bf16.msra.mxu0 %v2261_v38 }
  0x94   : > { %1721 = vmatprep.subr.bf16.mxu1 %v2274_v43  ;;  %906 = vmatprep.subr.bf16.mxu0 %v2038_v1  ;;  %v895_v1 = vld [vmem:[%s2032_s24 + $0x38] sm:$0xff] }
  0x96   : > { %752 = vmatmul.mubr.bf16.vlgmr.msra.gmra.mrb[16].mxu1 %v2279_v46  ;;  %813 = vmatmul.mubr.bf16.vlgmr.msra.gmra.mrb[0].mxu0 %v776_v48  ;;  %v903_v46 = vpack.c.bf16 %v897_v58, %v895_v1 }
  0x97   : > { %1722 = vmatpush3.bf16.msra.mxu1 %v2289_v50  ;;  %907 = vmatpush1.bf16.msra.mxu0 %v2043_v2  ;;  %v778_v2 = vpack.c.bf16 %v774_v57, %v772_v56 }
  0x98   : > { %1723 = vmatprep.subr.bf16.mxu1 %v2296_v51  ;;  %908 = vmatprep.subr.bf16.mxu0 %v2050_v3  ;;  %v894_v3 = vld [vmem:[%s2032_s24 + $0x30] sm:$0xff] }
  0x99   : > { %759 = vmatprep.mubr.bf16.mxu1 %v2300_v53  ;;  %822 = vmatprep.mubr.bf16.mxu0 %v779_v55 }
  0x9b   : > { %1724 = vmatpush3.bf16.msra.mxu1 %v2307_v54  ;;  %909 = vmatpush1.bf16.msra.mxu0 %v2057_v4  ;;  %v896_v4 = vld [vmem:[%s2032_s24 + $0x70] sm:$0xff] }
  0x9c   : > { %1725 = vmatprep.subr.bf16.mxu1 %v2320_v59  ;;  %910 = vmatprep.subr.bf16.mxu0 %v2064_v5  ;;  %v899_v5 = vld [vmem:[%s2032_s24 + $0xb8] sm:$0xff] }
  0x9e   : > { %760 = vmatmul.mubr.bf16.gmra.mrb[20].mxu1 %v2324_v61  ;;  %823 = vmatmul.mubr.bf16.gmra.mrb[4].mxu0 %v778_v2 }
  0x9f   : > { %1726 = vmatpush3.bf16.msra.mxu1 %v2333_v0  ;;  %911 = vmatpush1.bf16.msra.mxu0 %v2071_v6  ;;  %v901_v6 = vld [vmem:[%s2032_s24 + $0xf8] sm:$0xff] }
  0xa0   : > { %1727 = vmatprep.subr.bf16.mxu1 %v2340_v14  ;;  %912 = vmatprep.subr.bf16.mxu0 %v2078_v7  ;;  %v902_v7 = vpack.c.bf16 %v896_v4, %v894_v3 }
  0xa1   : > { %865 = vmatprep.mubr.bf16.mxu1 %v2342_v15  ;;  %938 = vmatprep.mubr.bf16.mxu0 %v903_v46 }
  0xa3   : > { %1728 = vmatpush3.bf16.msra.mxu1 %v2350_v19  ;;  %913 = vmatpush1.bf16.msra.mxu0 %v2085_v8  ;;  %v905_v8 = vpack.c.bf16 %v901_v6, %v899_v5 }
  0xa4   : > { %1729 = vmatprep.subr.bf16.mxu1 %v2357_v20  ;;  %914 = vmatprep.subr.bf16.mxu0 %v2092_v9  ;;  %v898_v9 = vld [vmem:[%s2032_s24 + $0xb0] sm:$0xff] }
  0xa7   : > { %1730 = vmatpush3.bf16.msra.mxu1 %v2366_v39  ;;  %915 = vmatpush1.bf16.msra.mxu0 %v2099_v10  ;;  %v900_v10 = vld [vmem:[%s2032_s24 + $0xf0] sm:$0xff] }
  0xa8   : > { %1731 = vmatprep.subr.bf16.mxu1 %v2373_v40  ;;  %916 = vmatprep.subr.bf16.mxu0 %v2106_v11  ;;  %v904_v11 = vpack.c.bf16 %v900_v10, %v898_v9 }
  0xab   : > { %1732 = vmatpush3.bf16.msra.mxu1 %v2380_v17  ;;  %917 = vmatpush1.bf16.msra.mxu0 %v2113_v12 }
  0xac   : > { %1733 = vmatprep.subr.bf16.mxu1 %v2387_v41  ;;  %918 = vmatprep.subr.bf16.mxu0 %v2120_v13 }
  0xaf   : > { %1734 = vmatpush3.bf16.msra.mxu1 %v2394_v42  ;;  %919 = vmatpush1.bf16.msra.mxu0 %v2127_v16 }
  0xb0   : > { %1735 = vmatprep.subr.bf16.mxu1 %v2401_v44  ;;  %920 = vmatprep.subr.bf16.mxu0 %v2136_v18 }
  0xb3   : > { %1736 = vmatpush3.bf16.msra.mxu1 %v2408_v47  ;;  %921 = vmatpush1.bf16.msra.mxu0 %v2150_v22 }
  0xb4   : > { %922 = vmatprep.subr.bf16.mxu0 %v2157_v23  ;;  %1749 = vmatprep.subr.bf16.mxu1 %v2274_v43 }
  0xb6   : > { %866 = vmatmul.mubr.bf16.vlgmr.msra.gmra.mrb[24].mxu1 %v776_v48 }
  0xb7   : > { %923 = vmatpush1.bf16.msra.mxu0 %v2165_v24  ;;  %1750 = vmatpush3.bf16.msra.mxu1 %v2289_v50 }
  0xb8   : > { %924 = vmatprep.subr.bf16.mxu0 %v2172_v25  ;;  %1751 = vmatprep.subr.bf16.mxu1 %v2296_v51 }
  0xb9   : > { %873 = vmatprep.mubr.bf16.mxu1 %v779_v55 }
  0xbb   : > { %925 = vmatpush1.bf16.msra.mxu0 %v2179_v26  ;;  %1752 = vmatpush3.bf16.msra.mxu1 %v2307_v54 }
  0xbc   : > { %926 = vmatprep.subr.bf16.mxu0 %v2186_v27  ;;  %1753 = vmatprep.subr.bf16.mxu1 %v2320_v59 }
  0xbe   : > { %874 = vmatmul.mubr.bf16.gmra.mrb[28].mxu1 %v778_v2 }
  0xbf   : > { %927 = vmatpush1.bf16.msra.mxu0 %v2193_v28  ;;  %1754 = vmatpush3.bf16.msra.mxu1 %v2333_v0 }
  0xc0   : > { %928 = vmatprep.subr.bf16.mxu0 %v2200_v29  ;;  %1755 = vmatprep.subr.bf16.mxu1 %v2340_v14 }
  0xc1   : > { %991 = vmatprep.mubr.bf16.mxu1 %v903_v46 }
  0xc3   : > { %929 = vmatpush1.bf16.msra.mxu0 %v2207_v30  ;;  %1756 = vmatpush3.bf16.msra.mxu1 %v2350_v19 }
  0xc4   : > { %930 = vmatprep.subr.bf16.mxu0 %v2214_v31  ;;  %1757 = vmatprep.subr.bf16.mxu1 %v2357_v20 }
  0xc7   : > { %931 = vmatpush1.bf16.msra.mxu0 %v2221_v32  ;;  %1758 = vmatpush3.bf16.msra.mxu1 %v2366_v39 }
  0xc8   : > { %932 = vmatprep.subr.bf16.mxu0 %v2228_v33  ;;  %1759 = vmatprep.subr.bf16.mxu1 %v2373_v40 }
  0xcb   : > { %933 = vmatpush1.bf16.msra.mxu0 %v2235_v34  ;;  %1760 = vmatpush3.bf16.msra.mxu1 %v2380_v17 }
  0xcc   : > { %934 = vmatprep.subr.bf16.mxu0 %v2242_v35  ;;  %1761 = vmatprep.subr.bf16.mxu1 %v2387_v41 }
  0xcf   : > { %935 = vmatpush1.bf16.msra.mxu0 %v2249_v36  ;;  %1762 = vmatpush3.bf16.msra.mxu1 %v2394_v42 }
  0xd0   : > { %936 = vmatprep.subr.bf16.mxu0 %v2256_v37  ;;  %1763 = vmatprep.subr.bf16.mxu1 %v2401_v44 }
  0xd3   : > { %937 = vmatpush1.bf16.msra.mxu0 %v2261_v38  ;;  %1764 = vmatpush3.bf16.msra.mxu1 %v2408_v47 }
  0xd6   : > { %939 = vmatmul.mubr.bf16.vlgmr.msra.gmra.mrb[0].mxu0 %v902_v7  ;;  %992 = vmatmul.mubr.bf16.vlgmr.msra.gmra.mrb[32].mxu1 %v902_v7 }
  0xd7   : > { %948 = vmatprep.mubr.bf16.mxu0 %v905_v8  ;;  %999 = vmatprep.mubr.bf16.mxu1 %v905_v8 }
  0xde   : > { %949 = vmatmul.mubr.bf16.gmra.mrb[4].mxu0 %v904_v11  ;;  %1000 = vmatmul.mubr.bf16.gmra.mrb[36].mxu1 %v904_v11 }
 0x129   : > { %v598_v12 = vpop.f32.mrb[0].mxu1 }
 0x12a   : > { %v600_v13 = vpop.f32.mrb[1].mxu1 }
 0x12b   : > { %v602_v16 = vpop.f32.mrb[2].mxu1 }
 0x12c   : > { %v2531_v18 = vpop.f32.mrb[3].mxu1 }
 0x131   : > { %v2533_v22 = vpop.f32.mrb[4].mxu1 }
 0x132   : > { %v2535_v23 = vpop.f32.mrb[5].mxu1 }
 0x133   : > { %v2537_v24 = vpop.f32.mrb[6].mxu1 }
 0x134   : > { %v2539_v25 = vpop.f32.mrb[7].mxu1 }
 0x149   : > { %v1681_v26 = vpop.f32.mrb[8].mxu1 }
 0x14a   : > { %v1682_v27 = vpop.f32.mrb[9].mxu1 }
 0x14b   : > { %v1683_v28 = vadd.f32 %v1682_v27, %v1681_v26  ;;  %v1684_v29 = vpop.f32.mrb[10].mxu1 }
 0x14c   : > { %v1685_v30 = vpop.f32.mrb[11].mxu1 }
 0x14d   : > { %v1686_v31 = vadd.f32 %v1685_v30, %v1684_v29 }
 0x151   : > { %v1687_v32 = vpop.f32.mrb[12].mxu1 }
 0x152   : > { %v1688_v33 = vpop.f32.mrb[13].mxu1 }
 0x153   : > { %v1689_v34 = vadd.f32 %v1688_v33, %v1687_v32  ;;  %v1690_v35 = vpop.f32.mrb[14].mxu1 }
 0x154   : > { %v1691_v36 = vpop.f32.mrb[15].mxu1 }
 0x155   : > { %v1692_v37 = vadd.f32 %v1691_v36, %v1690_v35 }
 0x169   : > { %v1709_v38 = vpop.f32.mrb[16].mxu1 }
 0x16a   : > { %v1710_v43 = vpop.f32.mrb[17].mxu1 }
 0x16b   : > { %v1711_v50 = vadd.f32 %v1710_v43, %v1709_v38  ;;  %v1712_v51 = vpop.f32.mrb[18].mxu1 }
 0x16c   : > { %v1713_v53 = vpop.f32.mrb[19].mxu1 }
 0x16d   : > { %v754_v54 = vadd.f32 %v1711_v50, %v1683_v28  ;;  %v1714_v59 = vadd.f32 %v1713_v53, %v1712_v51 }
 0x16f   : > { %v757_v60 = vadd.f32 %v1714_v59, %v1686_v31 }
 0x171   : > { %v1715_v61 = vpop.f32.mrb[20].mxu1 }
 0x172   : > { %v1716_v62 = vpop.f32.mrb[21].mxu1 }
 0x173   : > { %v1717_v63 = vadd.f32 %v1716_v62, %v1715_v61  ;;  %v1718_v0 = vpop.f32.mrb[22].mxu1 }
 0x174   : > { %v1719_v14 = vpop.f32.mrb[23].mxu1 }
 0x175   : > { %v762_v15 = vadd.f32 %v1717_v63, %v1689_v34  ;;  %v1720_v19 = vadd.f32 %v1719_v14, %v1718_v0  ;;  %v1075_v14 = vlaneseq }
 0x177   : > { %v765_v20 = vadd.f32 %v1720_v19, %v1692_v37  ;;  %v1068_v19 = vstv %s2023_s19 }
 0x189   : > { %v1737_v39 = vpop.f32.mrb[24].mxu1 }
 0x18a   : > { %v1738_v40 = vpop.f32.mrb[25].mxu1 }
 0x18b   : > { %v1739_v17 = vadd.f32 %v1738_v40, %v1737_v39  ;;  %v1740_v41 = vpop.f32.mrb[26].mxu1 }
 0x18c   : > { %v1741_v42 = vpop.f32.mrb[27].mxu1 }
 0x18d   : > { %v884_v44 = vadd.f32 %v1739_v17, %v754_v54  ;;  %v1742_v47 = vadd.f32 %v1741_v42, %v1740_v41  ;;  %v1985_v17 = vmov 0  }
 0x18f   : > { %v887_v21 = vadd.f32 %v1742_v47, %v757_v60 }
 0x191   : > { %v1743_v45 = vpop.f32.mrb[28].mxu1 }
 0x192   : > { %v1744_v48 = vpop.f32.mrb[29].mxu1 }
 0x193   : > { %v1745_v49 = vadd.f32 %v1744_v48, %v1743_v45  ;;  %v1746_v52 = vpop.f32.mrb[30].mxu1  ;;  %v1071_v48 = vld [vmem:[#allocation2 + $0x8] sm:$0xff] }
 0x194   : > { %v1747_v55 = vpop.f32.mrb[31].mxu1 }
 0x195   : > { %v890_v56 = vadd.f32 %v1745_v49, %v762_v15  ;;  %v1748_v57 = vadd.f32 %v1747_v55, %v1746_v52  ;;  %v1067_v15 = vld [vmem:[%s2888_s0] sm:$0x1] }
 0x196   : > { %vm1069_vm2 = vcmp.eq.s32.totalorder %v1067_v15, %v1068_v19  ;;  %v1103_v15 = vld [vmem:[%s2891_s3 + $0x30] sm:$0xff] (!%p1645_p5) }
 0x197   : > { %v893_v1 = vadd.f32 %v1748_v57, %v765_v20  ;;  %v1076_v20 = vshrl.u32 %v1075_v14, 7  ;;  %v1074_v41 = vsel %vm1069_vm2, 1, %v1985_v17  ;;  %v1110_v14 = vld [vmem:[%s2891_s3 + $0x68] sm:$0xff] (!%p1645_p5)  ;;  %v1111_v19 = vld [vmem:[%s2891_s3 + $0x70] sm:$0xff] (!%p1645_p5)  ;;  %v1112_v17 = vld [vmem:[%s2891_s3 + $0x78] sm:$0xff] (!%p1645_p5) }
 0x199   : > { %v1077_v40 = vsub.s32 0, %v1076_v20  ;;  %v1124_v20 = vld [vmem:[%s2892_s4 + $0x38] sm:$0xff] (!%p1645_p5) }
 0x19b   : > { %v1078_v47 = vrot.slane %v1074_v41, %v1077_v40  ;;  %v1104_v40 = vld [vmem:[%s2891_s3 + $0x38] sm:$0xff] (!%p1645_p5)  ;;  %v1126_v41 = vld [vmem:[%s2892_s4 + $0x48] sm:$0xff] (!%p1645_p5) }
 0x19d   : > { %vm1079_vm5 = vcmp.eq.s32.totalorder %v1078_v47, 1  ;;  %v1127_v47 = vld [vmem:[%s2892_s4 + $0x50] sm:$0xff] (!%p1645_p5) }
 0x1a9   : > { %v940_v58 = vpop.f32.mrb[0].mxu0  ;;  %v1765_v2 = vpop.f32.mrb[32].mxu1 }
 0x1aa   : > { %v1837_v46 = vadd.f32 %v940_v58, %v598_v12  ;;  %v942_v3 = vpop.f32.mrb[1].mxu0  ;;  %v1766_v4 = vpop.f32.mrb[33].mxu1  ;;  %v1070_v58 = vld [vmem:[#allocation2] sm:$0xff] }
 0x1ab   : > { %v1838_v5 = vadd.f32 %v942_v3, %v600_v13  ;;  %v1767_v6 = vadd.f32 %v1766_v4, %v1765_v2  ;;  %v944_v7 = vpop.f32.mrb[2].mxu0  ;;  %v1768_v8 = vpop.f32.mrb[34].mxu1 }
 0x1ac   : > { %v1839_v9 = vadd.f32 %v944_v7, %v602_v16  ;;  %v946_v10 = vpop.f32.mrb[3].mxu0  ;;  %v1769_v11 = vpop.f32.mrb[35].mxu1  ;;  %v1021_v26 = vsel %vm1020_vm1, %v1837_v46, -inf }
 0x1ad   : > { %v1840_v27 = vadd.f32 %v946_v10, %v2531_v18  ;;  %v1770_v28 = vadd.f32 %v1769_v11, %v1768_v8  ;;  %1022 = vmax.xlane.f32.xlu0 %v1021_v26  ;;  %v1010_v29 = vadd.f32 %v1767_v6, %v884_v44  ;;  %v1033_v12 = vsel %vm1020_vm1, %v1838_v5, -inf }
 0x1ae   : > { %v1024_v53 = vsel %vm1020_vm1, %v1839_v9, -inf  ;;  %v1072_v9 = vld [vmem:[#allocation2 + $0x10] sm:$0xff] }
 0x1af   : > { %v1036_v30 = vsel %vm1020_vm1, %v1840_v27, -inf  ;;  %v1013_v31 = vadd.f32 %v1770_v28, %v887_v21  ;;  %v1045_v61 = vsel %vm1020_vm1, %v1010_v29, -inf  ;;  %v1073_v29 = vld [vmem:[#allocation2 + $0x18] sm:$0xff] }
 0x1b0   : > { %1037 = vmax.xlane.f32.xlu1 %v1036_v30 }
 0x1b1   : > { %v950_v13 = vpop.f32.mrb[4].mxu0  ;;  %1034 = vmax.xlane.f32.xlu0 %v1033_v12  ;;  %v1771_v32 = vpop.f32.mrb[36].mxu1  ;;  %v1048_v38 = vsel %vm1020_vm1, %v1013_v31, -inf }
 0x1b2   : > { %v1841_v16 = vadd.f32 %v950_v13, %v2533_v22  ;;  %v952_v33 = vpop.f32.mrb[5].mxu0  ;;  %v1772_v34 = vpop.f32.mrb[37].mxu1 }
 0x1b3   : > { %v1842_v35 = vadd.f32 %v952_v33, %v2535_v23  ;;  %v1773_v36 = vadd.f32 %v1772_v34, %v1771_v32  ;;  %v954_v18 = vpop.f32.mrb[6].mxu0  ;;  %v1774_v37 = vpop.f32.mrb[38].mxu1 }
 0x1b4   : > { %v1843_v43 = vadd.f32 %v954_v18, %v2537_v24  ;;  %v956_v50 = vpop.f32.mrb[7].mxu0  ;;  %v1775_v51 = vpop.f32.mrb[39].mxu1  ;;  %1049 = vmax.xlane.f32.xlu1 %v1048_v38  ;;  %v1027_v60 = vsel %vm1020_vm1, %v1841_v16, -inf  ;;  %v1105_v18 = vld [vmem:[%s2891_s3 + $0x40] sm:$0xff] (!%p1645_p5) }
 0x1b5   : > { %v1844_v54 = vadd.f32 %v956_v50, %v2539_v25  ;;  %v1776_v59 = vadd.f32 %v1775_v51, %v1774_v37  ;;  %1025 = vmax.xlane.f32.xlu0 %v1024_v53  ;;  %v1016_v22 = vadd.f32 %v1773_v36, %v890_v56  ;;  %v1039_v62 = vsel %vm1020_vm1, %v1842_v35, -inf  ;;  %v1097_v36 = vld [vmem:[%s2891_s3] sm:$0xff] (!%p1645_p5)  ;;  %1817 = vmatprep.mubr.msk.f32.mxu1 (!%p1645_p5), %vm1213_vm7, %v1105_v18  ;;  %v1098_v51 = vld [vmem:[%s2891_s3 + $0x8] sm:$0xff] (!%p1645_p5) }
 0x1b6   : > { %v1030_v24 = vsel %vm1020_vm1, %v1843_v43, -inf  ;;  %v1986_v37 = vmov (!%p1645_p5), 0   ;;  %1805 = vmatprep.mubr.msk.f32.mxu0 (!%p1645_p5), %vm1213_vm7, %v1097_v36  ;;  %v1119_v43 = vld [vmem:[%s2892_s4 + $0x10] sm:$0xff] (!%p1645_p5)  ;;  %v1117_v50 = vld [vmem:[%s2892_s4] sm:$0xff] (!%p1645_p5)  ;;  %v1106_v53 = vld [vmem:[%s2891_s3 + $0x48] sm:$0xff] (!%p1645_p5) }
 0x1b7   : > { %v1019_v23 = vadd.f32 %v1776_v59, %v893_v1  ;;  %v1042_v63 = vsel %vm1020_vm1, %v1844_v54, -inf  ;;  %v1051_v25 = vsel %vm1020_vm1, %v1016_v22, -inf  ;;  %1941 = vset.pattern.permute.xlu1 (!%p1645_p5), %v1986_v37  ;;  %1940 = vset.pattern.permute.xlu0 (!%p1645_p5), %v1986_v37  ;;  %v1099_v54 = vld [vmem:[%s2891_s3 + $0x10] sm:$0xff] (!%p1645_p5)  ;;  %v1120_v22 = vld [vmem:[%s2892_s4 + $0x18] sm:$0xff] (!%p1645_p5) }
 0x1b8   : > { %1028 = vmax.xlane.f32.xlu1 %v1027_v60  ;;  %v1107_v59 = vld [vmem:[%s2891_s3 + $0x50] sm:$0xff] (!%p1645_p5)  ;;  %v1118_v60 = vld [vmem:[%s2892_s4 + $0x8] sm:$0xff] (!%p1645_p5) }
 0x1b9   : > { %1046 = vmax.xlane.f32.xlu0 %v1045_v61  ;;  %v1054_v0 = vsel %vm1020_vm1, %v1019_v23, -inf  ;;  %v1100_v23 = vld [vmem:[%s2891_s3 + $0x18] sm:$0xff] (!%p1645_p5) }
 0x1ba   : > { %v1108_v61 = vld [vmem:[%s2891_s3 + $0x58] sm:$0xff] (!%p1645_p5) }
 0x1bc   : > { %1031 = vmax.xlane.f32.xlu1 %v1030_v24  ;;  %v1101_v24 = vld [vmem:[%s2891_s3 + $0x20] sm:$0xff] (!%p1645_p5) }
 0x1bd   : > { %1040 = vmax.xlane.f32.xlu0 %v1039_v62  ;;  %v1109_v62 = vld [vmem:[%s2891_s3 + $0x60] sm:$0xff] (!%p1645_p5) }
 0x1c0   : > { %1043 = vmax.xlane.f32.xlu1 %v1042_v63  ;;  %v1122_v63 = vld [vmem:[%s2892_s4 + $0x28] sm:$0xff] (!%p1645_p5) }
 0x1c1   : > { %1052 = vmax.xlane.f32.xlu0 %v1051_v25  ;;  %v1121_v25 = vld [vmem:[%s2892_s4 + $0x20] sm:$0xff] (!%p1645_p5) }
 0x1c4   : > { %1055 = vmax.xlane.f32.xlu1 %v1054_v0  ;;  %v1102_v0 = vld [vmem:[%s2891_s3 + $0x28] sm:$0xff] (!%p1645_p5) }
 0x1d5   : > { %1145 = vperm.xlu1 (!%p1645_p5), %1941, %v1119_v43  }
 0x1d7   : > { %1135 = vperm.xlu0 (!%p1645_p5), %1940, %v1117_v50  }
 0x1d9   : > { %1150 = vperm.xlu1 (!%p1645_p5), %1941, %v1120_v22  }
 0x1db   : > { %1140 = vperm.xlu0 (!%p1645_p5), %1940, %v1118_v60  }
 0x1dd   : > { %1160 = vperm.xlu1 (!%p1645_p5), %1941, %v1122_v63  }
 0x1df   : > { %1155 = vperm.xlu0 (!%p1645_p5), %1940, %v1121_v25  }
 0x1e1   : > { %1170 = vperm.xlu1 (!%p1645_p5), %1941, %v1124_v20  }
 0x1e5   : > { %1180 = vperm.xlu1 (!%p1645_p5), %1941, %v1126_v41  }
 0x23a   : > { %v1023_v39 = vpop.xlane.xlu0 %1022 }
 0x23d   : > { %v1038_v42 = vpop.xlane.xlu1 %1037 }
 0x23e   : > { %v1035_v44 = vpop.xlane.xlu0 %1034 }
 0x23f   : > { %v1058_v57 = vsel %vm1057_vm4, %v1023_v39, %v1035_v44  ;;  %v1123_v39 = vld [vmem:[%s2892_s4 + $0x30] sm:$0xff] (!%p1645_p5)  ;;  %v1128_v44 = vld [vmem:[%s2892_s4 + $0x58] sm:$0xff] (!%p1645_p5) }
 0x240   : > { %1165 = vperm.xlu0 (!%p1645_p5), %1940, %v1123_v39   ;;  %1190 = vperm.xlu1 (!%p1645_p5), %1941, %v1128_v44  }
 0x241   : > { %v1050_v21 = vpop.xlane.xlu1 %1049 }
 0x242   : > { %v1026_v45 = vpop.xlane.xlu0 %1025 }
 0x243   : > { %v1059_v49 = vsel %vm1057_vm4, %v1026_v45, %v1038_v42  ;;  %v1125_v42 = vld [vmem:[%s2892_s4 + $0x40] sm:$0xff] (!%p1645_p5) }
 0x244   : > { %v1064_v52 = vsel %vm1062_vm3, %v1059_v49, %v1050_v21  ;;  %1175 = vperm.xlu0 (!%p1645_p5), %1940, %v1125_v42   ;;  %v1130_v21 = vld [vmem:[%s2892_s4 + $0x68] sm:$0xff] (!%p1645_p5)  ;;  %v1129_v45 = vld [vmem:[%s2892_s4 + $0x60] sm:$0xff] (!%p1645_p5)  ;;  %v1131_v49 = vld [vmem:[%s2892_s4 + $0x70] sm:$0xff] (!%p1645_p5) }
 0x245   : > { %v1081_v55 = vsel %vm1079_vm5, %v1064_v52, -inf  ;;  %v1029_v56 = vpop.xlane.xlu1 %1028  ;;  %1200 = vperm.xlu1 (!%p1645_p5), %1941, %v1130_v21  }
 0x246   : > { %v1085_v1 = vmax.f32 %v1071_v48, %v1081_v55  ;;  %v1047_v2 = vpop.xlane.xlu0 %1046  ;;  %v1132_v48 = vld [vmem:[%s2892_s4 + $0x78] sm:$0xff] (!%p1645_p5) }
 0x247   : > { %v1063_v46 = vsel %vm1062_vm3, %v1058_v57, %v1047_v2 }
 0x248   : > { %1090 = vst.msk [vmem:[#allocation2 + $0x8] sm:$0xff] %vm1088_vm6, %v1085_v1  ;;  %v1080_v3 = vsel %vm1079_vm5, %v1063_v46, -inf  ;;  %1185 = vperm.xlu0 (!%p1645_p5), %1940, %v1127_v47  }
 0x249   : > { %v1084_v4 = vmax.f32 %v1070_v58, %v1080_v3  ;;  %v1032_v5 = vpop.xlane.xlu1 %1031  ;;  %1210 = vperm.xlu1 (!%p1645_p5), %1941, %v1132_v48  }
 0x24a   : > { %v1041_v6 = vpop.xlane.xlu0 %1040 }
 0x24b   : > { %1089 = vst.msk [vmem:[#allocation2] sm:$0xff] %vm1088_vm6, %v1084_v4  ;;  %v1060_v8 = vsel %vm1057_vm4, %v1029_v56, %v1041_v6 }
 0x24c   : > { %1195 = vperm.xlu0 (!%p1645_p5), %1940, %v1129_v45  }
 0x24d   : > { %v1044_v7 = vpop.xlane.xlu1 %1043 }
 0x24e   : > { %v1053_v10 = vpop.xlane.xlu0 %1052  ;;  %v1061_v27 = vsel %vm1057_vm4, %v1032_v5, %v1044_v7 }
 0x24f   : > { %v1065_v11 = vsel %vm1062_vm3, %v1060_v8, %v1053_v10  ;;  %v1114_v16 = vld [vmem:[#allocation2 + $0x8] sm:$0xff] (!%p1645_p5) }
 0x250   : > { %v1082_v26 = vsel %vm1079_vm5, %v1065_v11, -inf  ;;  %1096 = sbr.rel (%p1645_p5) target bundleno = 945 (0x3b1), region = 48  ;;  %1205 = vperm.xlu0 (!%p1645_p5), %1940, %v1131_v49  }
 0x251   : > { %v1086_v28 = vmax.f32 %v1072_v9, %v1082_v26  ;;  %v1056_v30 = vpop.xlane.xlu1 %1055 }
 0x252   : > { %v1066_v31 = vsel %vm1062_vm3, %v1061_v27, %v1056_v30  ;;  %v1113_v32 = vld [vmem:[#allocation2] sm:$0xff] (!%p1645_p5) }
 0x253   : > { %1091 = vst.msk [vmem:[#allocation2 + $0x10] sm:$0xff] %vm1088_vm6, %v1086_v28  ;;  %v1083_v12 = vsel %vm1079_vm5, %v1066_v31, -inf  ;;  %v1829_v34 = vpack.c.bf16 (!%p1645_p5), %v1114_v16, %v1113_v32 }
 0x254   : > { %v1087_v13 = vmax.f32 %v1073_v29, %v1083_v12 }
 0x255   : > { %1830 = vmatprep.subr.bf16.mxu0 (!%p1645_p5), %v1829_v34  ;;  %1861 = vmatprep.subr.bf16.mxu1 (!%p1645_p5), %v1829_v34  ;;  %v1146_v52 = vpop.permute.xlu1 (!%p1645_p5), %1145 }
 0x256   : > { %1092 = vst.msk [vmem:[#allocation2 + $0x18] sm:$0xff] %vm1088_vm6, %v1087_v13  ;;  %1832 = vmatpush3.bf16.msra.mxu0 (!%p1645_p5), %v1829_v34  ;;  %1863 = vmatpush3.bf16.msra.mxu1 (!%p1645_p5), %v1829_v34  ;;  %v1136_v55 = vpop.permute.xlu0 (!%p1645_p5), %1135 }
 0x259   : > { %v1151_v56 = vpop.permute.xlu1 %1150 }
 0x25a   : > { %v1115_v33 = vld [vmem:[#allocation2 + $0x10] sm:$0xff]  ;;  %v1141_v57 = vpop.permute.xlu0 %1140 }
 0x25d   : > { %v1116_v35 = vld [vmem:[#allocation2 + $0x18] sm:$0xff]  ;;  %v1161_v1 = vpop.permute.xlu1 %1160 }
 0x25e   : > { %v1833_v38 = vpack.c.bf16 %v1116_v35, %v1115_v33  ;;  %v1156_v58 = vpop.permute.xlu0 %1155 }
 0x260   : > { %1834 = vmatprep.subr.bf16.mxu0 %v1833_v38  ;;  %1862 = vmatprep.subr.bf16.mxu1 %v1833_v38 }
 0x261   : > { %1836 = vmatpush3.bf16.msra.mxu0 %v1833_v38  ;;  %1864 = vmatpush3.bf16.msra.mxu1 %v1833_v38  ;;  %v1171_v2 = vpop.permute.xlu1 %1170 }
 0x264   : > { %1806 = vmatmul.mubr.msk.f32.vlgmr.msra.gmra.mrb[0].mxu0 %vm1213_vm7, %v1098_v51  ;;  %1818 = vmatmul.mubr.msk.f32.vlgmr.msra.gmra.mrb[0].mxu1 %vm1213_vm7, %v1106_v53 }
 0x265   : > { %1808 = vmatprep.mubr.msk.f32.mxu0 %vm1213_vm7, %v1099_v54  ;;  %1820 = vmatprep.mubr.msk.f32.mxu1 %vm1213_vm7, %v1107_v59  ;;  %v1181_v3 = vpop.permute.xlu1 %1180 }
 0x268   : > { %1809 = vmatmul.mubr.msk.f32.gmra.mrb[2].mxu0 %vm1213_vm7, %v1100_v23  ;;  %1821 = vmatmul.mubr.msk.f32.gmra.mrb[2].mxu1 %vm1213_vm7, %v1108_v61 }
 0x269   : > { %1811 = vmatprep.mubr.msk.f32.mxu0 %vm1213_vm7, %v1101_v24  ;;  %1823 = vmatprep.mubr.msk.f32.mxu1 %vm1213_vm7, %v1109_v62 }
 0x26c   : > { %1812 = vmatmul.mubr.msk.f32.gmra.mrb[4].mxu0 %vm1213_vm7, %v1102_v0  ;;  %1824 = vmatmul.mubr.msk.f32.gmra.mrb[4].mxu1 %vm1213_vm7, %v1110_v14 }
 0x26d   : > { %1814 = vmatprep.mubr.msk.f32.mxu0 %vm1213_vm7, %v1103_v15  ;;  %1826 = vmatprep.mubr.msk.f32.mxu1 %vm1213_vm7, %v1111_v19 }
 0x270   : > { %1815 = vmatmul.mubr.msk.f32.gmra.mrb[6].mxu0 %vm1213_vm7, %v1104_v40  ;;  %1827 = vmatmul.mubr.msk.f32.gmra.mrb[6].mxu1 %vm1213_vm7, %v1112_v17 }
 0x2bf   : > { %v1166_v46 = vpop.permute.xlu0 %1165  ;;  %v1191_v5 = vpop.permute.xlu1 %1190 }
 0x2c3   : > { %v1176_v4 = vpop.permute.xlu0 %1175 }
 0x2c4   : > { %v1201_v30 = vpop.permute.xlu1 %1200 }
 0x2c7   : > { %v1186_v6 = vpop.permute.xlu0 %1185 }
 0x2c8   : > { %v1211_v20 = vpop.permute.xlu1 %1210 }
 0x2cb   : > { %v1196_v31 = vpop.permute.xlu0 %1195 }
 0x2cf   : > { %v1206_v42 = vpop.permute.xlu0 %1205 }
 0x337   : > { %v1807_v7 = vpop.f32.mrb[0].mxu0  ;;  %v1819_v8 = vpop.f32.mrb[0].mxu1 }
 0x338   : > { %v1328_v9 = vpop.f32.mrb[1].mxu0  ;;  %v1368_v10 = vpop.f32.mrb[1].mxu1  ;;  %v2691_v29 = vadd.f32 %v1807_v7, %v1141_v57  ;;  %v2693_v12 = vadd.f32 %v1819_v8, %v1181_v3 }
 0x339   : > { %v2695_v13 = vadd.f32 %v1328_v9, %v1136_v55  ;;  %v2697_v32 = vadd.f32 %v1368_v10, %v1176_v4 }
 0x33a   : > { %v1408_v37 = vsel %vm1088_vm6, %v2691_v29, -inf  ;;  %v1421_v51 = vsel %vm1088_vm6, %v2693_v12, -inf }
 0x33b   : > { %v1810_v11 = vpop.f32.mrb[2].mxu0  ;;  %v1822_v26 = vpop.f32.mrb[2].mxu1  ;;  %v1407_v53 = vsel %vm1088_vm6, %v2695_v13, -inf  ;;  %v1419_v22 = vsel %vm1088_vm6, %v2697_v32, -inf }
 0x33c   : > { %v1338_v27 = vpop.f32.mrb[3].mxu0  ;;  %v1378_v28 = vpop.f32.mrb[3].mxu1  ;;  %v2699_v34 = vadd.f32 %v1810_v11, %v1151_v56  ;;  %v2721_v60 = vadd.f32 %v1822_v26, %v1191_v5 }
 0x33d   : > { %v2705_v38 = vadd.f32 %v1338_v27, %v1146_v52  ;;  %v2727_v25 = vadd.f32 %v1378_v28, %v1186_v6 }
 0x33e   : > { %v1410_v63 = vsel %vm1088_vm6, %v2699_v34, -inf  ;;  %v1425_v56 = vsel %vm1088_vm6, %v2721_v60, -inf }
 0x33f   : > { %v1813_v16 = vpop.f32.mrb[4].mxu0  ;;  %v1825_v33 = vpop.f32.mrb[4].mxu1  ;;  %v1409_v39 = vsel %vm1088_vm6, %v2705_v38, -inf }
 0x340   : > { %v2701_v35 = vadd.f32 %v1813_v16, %v1161_v1  ;;  %v1348_v36 = vpop.f32.mrb[5].mxu0  ;;  %v1388_v18 = vpop.f32.mrb[5].mxu1  ;;  %v2707_v43 = vadd.f32 %v1825_v33, %v1201_v30 }
 0x341   : > { %v2709_v50 = vadd.f32 %v1348_v36, %v1156_v58  ;;  %v2717_v59 = vadd.f32 %v1388_v18, %v1196_v31  ;;  %v1423_v58 = vsel %vm1088_vm6, %v2727_v25, -inf }
 0x342   : > { %v1413_v54 = vsel %vm1088_vm6, %v2701_v35, -inf  ;;  %v1429_v17 = vsel %vm1088_vm6, %v2707_v43, -inf }
 0x343   : > { %v1414_v23 = vmax.f32 %v1408_v37, %v1413_v54  ;;  %v1411_v61 = vsel %vm1088_vm6, %v2709_v50, -inf  ;;  %v1816_v24 = vpop.f32.mrb[6].mxu0  ;;  %v1828_v62 = vpop.f32.mrb[6].mxu1  ;;  %v1427_v47 = vsel %vm1088_vm6, %v2717_v59, -inf }
 0x344   : > { %v1412_v0 = vmax.f32 %v1407_v53, %v1411_v61  ;;  %v2729_v14 = vadd.f32 %v1816_v24, %v1171_v2  ;;  %v1358_v15 = vpop.f32.mrb[7].mxu0  ;;  %v1398_v19 = vpop.f32.mrb[7].mxu1  ;;  %v2739_v45 = vadd.f32 %v1828_v62, %v1211_v20 }
 0x345   : > { %v1422_v40 = vmax.f32 %v1414_v23, %v1421_v51  ;;  %v1359_v41 = vadd.f32 %v1358_v15, %v1166_v46  ;;  %v2742_v55 = vadd.f32 %v1398_v19, %v1206_v42 }
 0x346   : > { %v1420_v44 = vmax.f32 %v1412_v0, %v1419_v22  ;;  %v1417_v21 = vsel %vm1088_vm6, %v2729_v14, -inf  ;;  %v1433_v3 = vsel %vm1088_vm6, %v2739_v45, -inf }
 0x347   : > { %v1430_v48 = vmax.f32 %v1422_v40, %v1429_v17  ;;  %v1418_v49 = vmax.f32 %v1410_v63, %v1417_v21  ;;  %v1415_v52 = vsel %vm1088_vm6, %v1359_v41, -inf  ;;  %v1431_v6 = vsel %vm1088_vm6, %v2742_v55, -inf }
 0x348   : > { %v1428_v57 = vmax.f32 %v1420_v44, %v1427_v47  ;;  %v1416_v1 = vmax.f32 %v1409_v39, %v1415_v52 }
 0x349   : > { %v1426_v2 = vmax.f32 %v1418_v49, %v1425_v56 }
 0x34a   : > { %v1435_v46 = vmax.f32 %v1428_v57, %v1430_v48  ;;  %v1424_v4 = vmax.f32 %v1416_v1, %v1423_v58 }
 0x34b   : > { %v1434_v5 = vmax.f32 %v1426_v2, %v1433_v3 }
 0x34c   : > { %v1432_v7 = vmax.f32 %v1424_v4, %v1431_v6 }
 0x34e   : > { %v1436_v8 = vmax.f32 %v1432_v7, %v1434_v5 }
 0x350   : > { %v1437_v9 = vmax.f32 %v1435_v46, %v1436_v8 }
 0x352   : > { %v1438_v10 = vrot.slane %v1437_v9, 4 }
 0x354   : > { %v1439_v11 = vmax.f32 %v1437_v9, %v1438_v10 }
 0x356   : > { %v1440_v26 = vrot.slane %v1439_v11, 2 }
 0x358   : > { %v1441_v27 = vmax.f32 %v1439_v11, %v1440_v26 }
 0x35a   : > { %v1442_v28 = vrot.slane %v1441_v27, 1 }
 0x35c   : > { %v2752_v30 = vmax.f32 %v1441_v27, %v1442_v28 }
 0x35e   : > { %v1444_v31 = vsub.f32 %v2695_v13, %v2752_v30  ;;  %v1445_v16 = vsub.f32 %v2691_v29, %v2752_v30  ;;  %v1446_v33 = vsub.f32 %v2705_v38, %v2752_v30  ;;  %v1447_v36 = vsub.f32 %v2699_v34, %v2752_v30 }
 0x35f   : > { %v1448_v18 = vsub.f32 %v2709_v50, %v2752_v30  ;;  %v1449_v37 = vsub.f32 %v2701_v35, %v2752_v30  ;;  %v1450_v51 = vsub.f32 %v1359_v41, %v2752_v30  ;;  %v1451_v13 = vsub.f32 %v2729_v14, %v2752_v30 }
 0x360   : > { %v1452_v29 = vsub.f32 %v2697_v32, %v2752_v30  ;;  %v1453_v38 = vsub.f32 %v2693_v12, %v2752_v30  ;;  %v1454_v34 = vsub.f32 %v2727_v25, %v2752_v30  ;;  %v1455_v50 = vsub.f32 %v2721_v60, %v2752_v30 }
 0x361   : > { %v1456_v35 = vsub.f32 %v2717_v59, %v2752_v30  ;;  %v1457_v53 = vsub.f32 %v2707_v43, %v2752_v30  ;;  %v1458_v54 = vsub.f32 %v2742_v55, %v2752_v30  ;;  %v1459_v32 = vsub.f32 %v2739_v45, %v2752_v30 }
 0x362   : > { %v1460_v22 = vmul.f32 1.442695, %v1444_v31  ;;  %v1462_v12 = vmul.f32 1.442695, %v1445_v16  ;;  %v1464_v23 = vmul.f32 1.442695, %v1446_v33 }
 0x363   : > { %v1466_v61 = vmul.f32 1.442695, %v1447_v36  ;;  %v1468_v24 = vmul.f32 1.442695, %v1448_v18  ;;  %v1470_v60 = vmul.f32 1.442695, %v1449_v37 }
 0x364   : > { %1942 = vpow2.f32 %v1460_v22  ;;  %v1472_v59 = vmul.f32 1.442695, %v1450_v51  ;;  %v1474_v43 = vmul.f32 1.442695, %v1451_v13  ;;  %v1476_v62 = vmul.f32 1.442695, %v1452_v29 }
 0x365   : > { %1944 = vpow2.f32 %v1462_v12  ;;  %v1478_v0 = vmul.f32 1.442695, %v1453_v38  ;;  %v1480_v39 = vmul.f32 1.442695, %v1454_v34  ;;  %v1482_v42 = vmul.f32 1.442695, %v1455_v50 }
 0x366   : > { %1946 = vpow2.f32 %v1464_v23  ;;  %v1484_v45 = vmul.f32 1.442695, %v1456_v35  ;;  %v1486_v55 = vmul.f32 1.442695, %v1457_v53  ;;  %v1488_v58 = vmul.f32 1.442695, %v1458_v54 }
 0x367   : > { %1948 = vpow2.f32 %v1466_v61  ;;  %v1490_v4 = vmul.f32 1.442695, %v1459_v32 }
 0x368   : > { %1950 = vpow2.f32 %v1468_v24 }
 0x369   : > { %1952 = vpow2.f32 %v1470_v60 }
 0x36a   : > { %1954 = vpow2.f32 %v1472_v59 }
 0x36b   : > { %1956 = vpow2.f32 %v1474_v43 }
 0x36c   : > { %1958 = vpow2.f32 %v1476_v62 }
 0x36d   : > { %1960 = vpow2.f32 %v1478_v0 }
 0x36e   : > { %v2785_v63 = vpop.eup %1942  ;;  %1962 = vpow2.f32 %v1480_v39 }
 0x36f   : > { %v2787_v25 = vpop.eup %1944  ;;  %v1492_v14 = vsel %vm1088_vm6, %v2785_v63, 0.0  ;;  %1964 = vpow2.f32 %v1482_v42 }
 0x370   : > { %v2791_v15 = vpop.eup %1946  ;;  %v1493_v19 = vsel %vm1088_vm6, %v2787_v25, 0.0  ;;  %1966 = vpow2.f32 %v1484_v45 }
 0x371   : > { %v2795_v20 = vpop.eup %1948  ;;  %v1494_v40 = vadd.f32 %v1493_v19, %v1492_v14  ;;  %v1495_v17 = vsel %vm1088_vm6, %v2791_v15, 0.0  ;;  %1968 = vpow2.f32 %v1486_v55 }
 0x372   : > { %v2799_v41 = vpop.eup %1950  ;;  %v1497_v47 = vsel %vm1088_vm6, %v2795_v20, 0.0  ;;  %1970 = vpow2.f32 %v1488_v58 }
 0x373   : > { %v1496_v44 = vadd.f32 %v1495_v17, %v1494_v40  ;;  %v1953_v21 = vpop.eup %1952  ;;  %v1499_v49 = vsel %vm1088_vm6, %v2799_v41, 0.0  ;;  %1972 = vpow2.f32 %v1490_v4 }
 0x374   : > { %v1955_v52 = vpop.eup %1954  ;;  %v1501_v57 = vsel %vm1088_vm6, %v1953_v21, 0.0 }
 0x375   : > { %v1498_v48 = vadd.f32 %v1497_v47, %v1496_v44  ;;  %v1957_v1 = vpop.eup %1956  ;;  %v1503_v46 = vsel %vm1088_vm6, %v1955_v52, 0.0 }
 0x376   : > { %v1959_v3 = vpop.eup %1958  ;;  %v1505_v6 = vsel %vm1088_vm6, %v1957_v1, 0.0 }
 0x377   : > { %v1500_v56 = vadd.f32 %v1499_v49, %v1498_v48  ;;  %v1961_v7 = vpop.eup %1960  ;;  %v1507_v9 = vsel %vm1088_vm6, %v1959_v3, 0.0 }
 0x378   : > { %v1963_v10 = vpop.eup %1962  ;;  %v1509_v26 = vsel %vm1088_vm6, %v1961_v7, 0.0 }
 0x379   : > { %v1502_v2 = vadd.f32 %v1501_v57, %v1500_v56  ;;  %v1965_v27 = vpop.eup %1964  ;;  %v1511_v30 = vsel %vm1088_vm6, %v1963_v10, 0.0 }
 0x37a   : > { %v1967_v31 = vpop.eup %1966  ;;  %v1513_v33 = vsel %vm1088_vm6, %v1965_v27, 0.0 }
 0x37b   : > { %v1504_v5 = vadd.f32 %v1503_v46, %v1502_v2  ;;  %v1969_v36 = vpop.eup %1968  ;;  %v1515_v37 = vsel %vm1088_vm6, %v1967_v31, 0.0 }
 0x37c   : > { %v1971_v51 = vpop.eup %1970  ;;  %v1517_v29 = vsel %vm1088_vm6, %v1969_v36, 0.0 }
 0x37d   : > { %v1506_v8 = vadd.f32 %v1505_v6, %v1504_v5  ;;  %v1973_v38 = vpop.eup %1972  ;;  %v1519_v50 = vsel %vm1088_vm6, %v1971_v51, 0.0 }
 0x37e   : > { %v1521_v53 = vsel %vm1088_vm6, %v1973_v38, 0.0 }
 0x37f   : > { %v1508_v11 = vadd.f32 %v1507_v9, %v1506_v8 }
 0x381   : > { %v1510_v28 = vadd.f32 %v1509_v26, %v1508_v11 }
 0x383   : > { %v1512_v16 = vadd.f32 %v1511_v30, %v1510_v28 }
 0x385   : > { %v1514_v18 = vadd.f32 %v1513_v33, %v1512_v16 }
 0x387   : > { %v1516_v13 = vadd.f32 %v1515_v37, %v1514_v18 }
 0x389   : > { %v1518_v34 = vadd.f32 %v1517_v29, %v1516_v13 }
 0x38b   : > { %v1520_v35 = vadd.f32 %v1519_v50, %v1518_v34 }
 0x38d   : > { %v1522_v54 = vadd.f32 %v1521_v53, %v1520_v35 }
 0x38f   : > { %v1523_v32 = vrot.slane %v1522_v54, 4 }
 0x391   : > { %v1524_v22 = vadd.f32 %v1523_v32, %v1522_v54 }
 0x393   : > { %v1525_v12 = vrot.slane %v1524_v22, 2 }
 0x395   : > { %v1526_v23 = vadd.f32 %v1525_v12, %v1524_v22 }
 0x397   : > { %v1527_v61 = vrot.slane %v1526_v23, 1 }
 0x399   : > { %v1528_v24 = vadd.f32 %v1527_v61, %v1526_v23 }
 0x39b   : > { %1974 = vrcp.f32 %v1528_v24 }
 0x3a5   : > { %v1975_v60 = vpop.eup %1974 }
 0x3a6   : > { %v1530_v59 = vmul.f32 %v1975_v60, %v2785_v63  ;;  %v1531_v43 = vmul.f32 %v1975_v60, %v2787_v25  ;;  %v1532_v62 = vmul.f32 %v1975_v60, %v2791_v15  ;;  %v1533_v0 = vmul.f32 %v1975_v60, %v2795_v20 }
 0x3a7   : > { %v1534_v14 = vmul.f32 %v1975_v60, %v2799_v41  ;;  %v1535_v19 = vmul.f32 %v1975_v60, %v1953_v21  ;;  %v1536_v39 = vmul.f32 %v1975_v60, %v1955_v52  ;;  %v1537_v40 = vmul.f32 %v1975_v60, %v1957_v1 }
 0x3a8   : > { %v1538_v17 = vmul.f32 %v1975_v60, %v1959_v3  ;;  %v1539_v42 = vmul.f32 %v1975_v60, %v1961_v7  ;;  %v1540_v44 = vmul.f32 %v1975_v60, %v1963_v10  ;;  %v1541_v47 = vmul.f32 %v1975_v60, %v1965_v27  ;;  %1546 = vst.msk [vmem:[%s2893_s5] sm:$0xff] %vm1088_vm6, %v1530_v59 }
 0x3a9   : > { %1547 = vst.msk [vmem:[%s2893_s5 + $0x8] sm:$0xff] %vm1088_vm6, %v1531_v43  ;;  %1548 = vst.msk [vmem:[%s2893_s5 + $0x10] sm:$0xff] %vm1088_vm6, %v1532_v62  ;;  %v1542_v63 = vmul.f32 %v1975_v60, %v1967_v31  ;;  %v1543_v25 = vmul.f32 %v1975_v60, %v1969_v36  ;;  %v1544_v15 = vmul.f32 %v1975_v60, %v1971_v51 }
 0x3aa   : > { %1549 = vst.msk [vmem:[%s2893_s5 + $0x18] sm:$0xff] %vm1088_vm6, %v1533_v0  ;;  %v1545_v20 = vmul.f32 %v1975_v60, %v1973_v38  ;;  %1550 = vst.msk [vmem:[%s2893_s5 + $0x20] sm:$0xff] %vm1088_vm6, %v1534_v14 }
 0x3ab   : > { %1551 = vst.msk [vmem:[%s2893_s5 + $0x28] sm:$0xff] %vm1088_vm6, %v1535_v19  ;;  %1552 = vst.msk [vmem:[%s2893_s5 + $0x30] sm:$0xff] %vm1088_vm6, %v1536_v39 }
 0x3ac   : > { %1553 = vst.msk [vmem:[%s2893_s5 + $0x38] sm:$0xff] %vm1088_vm6, %v1537_v40  ;;  %1554 = vst.msk [vmem:[%s2893_s5 + $0x40] sm:$0xff] %vm1088_vm6, %v1538_v17 }
 0x3ad   : > { %1555 = vst.msk [vmem:[%s2893_s5 + $0x48] sm:$0xff] %vm1088_vm6, %v1539_v42  ;;  %1556 = vst.msk [vmem:[%s2893_s5 + $0x50] sm:$0xff] %vm1088_vm6, %v1540_v44 }
 0x3ae   : > { %1557 = vst.msk [vmem:[%s2893_s5 + $0x58] sm:$0xff] %vm1088_vm6, %v1541_v47  ;;  %1558 = vst.msk [vmem:[%s2893_s5 + $0x60] sm:$0xff] %vm1088_vm6, %v1542_v63 }
 0x3af   : > { %1559 = vst.msk [vmem:[%s2893_s5 + $0x68] sm:$0xff] %vm1088_vm6, %v1543_v25  ;;  %1560 = vst.msk [vmem:[%s2893_s5 + $0x70] sm:$0xff] %vm1088_vm6, %v1544_v15 }
 0x3b0   : > { %1561 = vst.msk [vmem:[%s2893_s5 + $0x78] sm:$0xff] %vm1088_vm6, %v1545_v20 }
 0x3b1 PF: > { %s15_s18 = sadd.s32 1, %s1982_s18  }
 0x3b2   : > { %p12_p6 = scmp.ge.s32.totalorder %s15_s18, 4  }
 0x3b4   :  { %14 = sbr.rel (!%p12_p6) target bundleno = 1 (0x1), region = 74 }

</bundles_post_ra>
